<compile_context>
chip_gen: v7x
topology: tpu7x:2x2x1
jax: 0.10.0
libtpu: 0.0.40
codegen_flags: <defaults>
</compile_context>

<pallas_src>
from functools import partial

import jax
import jax.numpy as jnp
from jax.experimental import pallas as pl
from jax.experimental.pallas import tpu as pltpu


def _round_up(x, m):
    return (x + m - 1) // m * m


def damd_kernel(tok_ref, wfold_ref, bconv_ref, w1_ref, b1_ref, w2_ref, b2_ref,
                out_ref, acc_ref, *, kernel_size, tile_l, v_pad, l_out):
    """One (batch-tile, L-tile) step of the fused DAMD forward."""
    K = kernel_size
    TL = tile_l
    l_idx = pl.program_id(1)
    n_l = pl.num_programs(1)

    TB = tok_ref.shape[1]
    C_pad = wfold_ref.shape[1]
    cdt = wfold_ref.dtype                     # compute dtype (bf16 by default)

    # ---- running-max accumulator init (first L tile of this batch tile) ----
    @pl.when(l_idx == 0)
    def _():
        acc_ref[...] = jnp.zeros_like(acc_ref)   # conv is post-ReLU (>= 0)

    # ---- halo token window for this (b, l) tile: (TB, >= TL + K - 1) -------
    tok_win = tok_ref[0]                                     # (TB, TL_halo) i32

    # ---- embedding + Conv1d fused as ONE lane-dense one-hot matmul ---------
    #   slab[b, li, k*V_pad + v] = (tok[b, li + k] == v)
    iota = jax.lax.broadcasted_iota(jnp.int32, (TB, TL, K * v_pad), 2)
    match = None
    for k in range(K):                                       # static unroll
        code = tok_win[:, k:k + TL][:, :, None] + k * v_pad  # (TB, TL, 1)
        hit = iota == code
        match = hit if match is None else jnp.logical_or(match, hit)
    slab = match.astype(cdt).reshape(TB * TL, K * v_pad)

    conv = jnp.dot(slab, wfold_ref[...],
                   preferred_element_type=jnp.float32)       # (TB*TL, C_pad)
    conv = jnp.maximum(conv + bconv_ref[...], 0.0).reshape(TB, TL, C_pad)

    # ---- adaptive_max_pool1d(1): running max across L tiles ----------------
    @pl.when(l_idx < n_l - 1)
    def _():
        acc_ref[...] = jnp.maximum(acc_ref[...], jnp.max(conv, axis=1))

    # ---- last L tile: mask L padding, final max, fc1 -> ReLU -> fc2 --------
    @pl.when(l_idx == n_l - 1)
    def _():
        # Only the final tile can contain positions >= l_out; post-ReLU conv
        # is >= 0, so forcing padded positions to 0 never changes the max.
        pos = jax.lax.broadcasted_iota(jnp.int32, (1, TL, 1), 1) + l_idx * TL
        conv_m = jnp.where(pos < l_out, conv, 0.0)
        gmp = jnp.maximum(acc_ref[...], jnp.max(conv_m, axis=1))  # (TB, C_pad)

        h1 = jnp.maximum(
            jnp.dot(gmp.astype(cdt), w1_ref[...],
                    preferred_element_type=jnp.float32) + b1_ref[...], 0.0)
        out_ref[...] = (jnp.dot(h1.astype(cdt), w2_ref[...],
                                preferred_element_type=jnp.float32)
                        + b2_ref[...])


def _pick_defaults():
    """Tile-sweep starting points per TPU generation (VMEM-capacity heuristic)."""
    vmem = 64 * 1024 * 1024
    try:
        vmem = pltpu.get_tpu_info().vmem_capacity_bytes
    except Exception:
        pass
    if vmem >= 100 * 1024 * 1024:            # v5e / v6e: 128 MiB VMEM
        return 512, 16, 80 * 1024 * 1024
    # v7x (64 MiB VMEM per TensorCore) or unknown: smaller tiles + headroom.
    return 256, 8, 48 * 1024 * 1024


def damd_forward(tokens, params, *, tile_l=None, tile_b=None,
                 vmem_limit_bytes=None, compute_dtype=jnp.bfloat16):
    """tokens: (B, L) int32 token ids. Returns (B, 1) f32 logits."""
    emb_table, wconv, bconv, w1, b1, w2, b2 = params

    dflt_l, dflt_b, dflt_vmem = _pick_defaults()
    tile_l = dflt_l if tile_l is None else tile_l
    tile_b = dflt_b if tile_b is None else tile_b
    vmem_limit_bytes = dflt_vmem if vmem_limit_bytes is None else vmem_limit_bytes

    B, L = tokens.shape
    V, E = emb_table.shape
    K, _, C = wconv.shape
    H = w1.shape[1]
    l_out = L - K + 1
    assert l_out >= 1, "sequence shorter than conv kernel"

    # ---- padded / folded parameter layout (once, outside the kernel) -------
    C_pad = _round_up(C, 128)
    H_pad = _round_up(H, 128)
    O_pad = 128
    V_pad = _round_up(V, 32)     # K * V_pad = 256 contraction (MXU-sized)

    # Fold embedding table into the conv weights (exact, linear).
    wfold = jnp.einsum("ve,kec->kvc", emb_table.astype(jnp.float32),
                       wconv.astype(jnp.float32))            # (K, V, C)
    wfold = jnp.pad(wfold, ((0, 0), (0, V_pad - V), (0, C_pad - C)))
    wfold = wfold.reshape(K * V_pad, C_pad).astype(compute_dtype)

    bconv_p = jnp.pad(bconv.astype(jnp.float32), ((0, 0), (0, C_pad - C)))
    w1_p = jnp.pad(w1.astype(jnp.float32),
                   ((0, C_pad - C), (0, H_pad - H))).astype(compute_dtype)
    b1_p = jnp.pad(b1.astype(jnp.float32), ((0, 0), (0, H_pad - H)))
    w2_p = jnp.pad(w2.astype(jnp.float32),
                   ((0, H_pad - H), (0, O_pad - 1))).astype(compute_dtype)
    b2_p = jnp.pad(b2.astype(jnp.float32), ((0, 0), (0, O_pad - 1)))

    # ---- tile geometry ------------------------------------------------------
    TB = max(8, _round_up(tile_b, 8))
    B_r8 = _round_up(B, 8)
    TB = min(TB, B_r8)
    if B_r8 // TB < 2 and TB > 8:
        # Keep >= 2 batch tiles so the "parallel" axis feeds both v7x cores.
        TB = max(8, _round_up(B_r8 // 2, 8))
    n_b = pl.cdiv(B_r8, TB)
    B_pad = n_b * TB

    TL = min(tile_l, _round_up(l_out, 8))
    n_l = pl.cdiv(l_out, TL)
    TL_halo = _round_up(TL + K - 1, 128)      # lane-dense halo window width

    # ---- per-L-tile halo token windows: (n_l, B_pad, TL_halo) int32 --------
    # VMEM per step is O(TL), not O(L); the token block is genuinely pipelined.
    L_need = (n_l - 1) * TL + TL_halo
    tok = jnp.pad(tokens.astype(jnp.int32), ((0, B_pad - B), (0, L_need - L)))
    # TODO(synk): for extremely long sequences, build the halo windows via an
    #             in-kernel make_async_copy instead of this trace-time stack.
    windows = jnp.stack([tok[:, l * TL:l * TL + TL_halo] for l in range(n_l)],
                        axis=0)

    kern = partial(damd_kernel, kernel_size=K, tile_l=TL, v_pad=V_pad,
                   l_out=l_out)

    out = pl.pallas_call(
        kern,
        out_shape=jax.ShapeDtypeStruct((B_pad, O_pad), jnp.float32),
        grid_spec=pltpu.PrefetchScalarGridSpec(
            num_scalar_prefetch=0,
            grid=(n_b, n_l),
            in_specs=[
                pl.BlockSpec((1, TB, TL_halo), lambda b, l: (l, b, 0)),   # tokens
                pl.BlockSpec((K * V_pad, C_pad), lambda b, l: (0, 0)),    # emb∘conv
                pl.BlockSpec((1, C_pad), lambda b, l: (0, 0)),            # conv bias
                pl.BlockSpec((C_pad, H_pad), lambda b, l: (0, 0)),        # fc1 w
                pl.BlockSpec((1, H_pad), lambda b, l: (0, 0)),            # fc1 b
                pl.BlockSpec((H_pad, O_pad), lambda b, l: (0, 0)),        # fc2 w
                pl.BlockSpec((1, O_pad), lambda b, l: (0, 0)),            # fc2 b
            ],
            out_specs=pl.BlockSpec((TB, O_pad), lambda b, l: (b, 0)),
            scratch_shapes=[pltpu.VMEM((TB, C_pad), jnp.float32)],        # run-max
        ),
        compiler_params=pltpu.CompilerParams(
            dimension_semantics=("parallel", "arbitrary"),
            vmem_limit_bytes=vmem_limit_bytes,
        ),
    )(windows, wfold, bconv_p, w1_p, b1_p, w2_p, b2_p)

    return out[:B, :1]


def init_params(key, num_tokens, embedding_dim, conv_channels=64,
                kernel_size=8, hidden=16):
    """Deterministic synthetic parameters (shapes mirror the torch module)."""
    keys = jax.random.split(key, 7)
    emb_table = jax.random.normal(
        keys[0], (num_tokens + 1, embedding_dim), jnp.float32) * 0.1
    # torch Conv1d weight is (C_out, E, K); stored here as (K, E, C_out)
    wconv = jax.random.normal(
        keys[1], (kernel_size, embedding_dim, conv_channels), jnp.float32) * 0.1
    bconv = jax.random.normal(keys[2], (1, conv_channels), jnp.float32) * 0.1
    w1 = jax.random.normal(keys[3], (conv_channels, hidden), jnp.float32) * 0.1
    b1 = jax.random.normal(keys[4], (1, hidden), jnp.float32) * 0.1
    w2 = jax.random.normal(keys[5], (hidden, 1), jnp.float32) * 0.1
    b2 = jax.random.normal(keys[6], (1, 1), jnp.float32) * 0.1
    return (emb_table, wconv, bconv, w1, b1, w2, b2)


def damd_reference(tokens, params):
    """Pure-JAX reference of the PyTorch forward (for correctness check)."""
    emb_table, wconv, bconv, w1, b1, w2, b2 = params
    x_emb = jnp.take(emb_table, tokens, axis=0)              # (B, L, E)
    K = wconv.shape[0]
    l_out = x_emb.shape[1] - K + 1
    acc = sum(
        jnp.einsum("ble,ec->blc", x_emb[:, k:k + l_out, :], wconv[k])
        for k in range(K)
    )
    conv = jnp.maximum(acc + bconv[None, :, :], 0.0)
    gmp = jnp.max(conv, axis=1)
    h1 = jnp.maximum(gmp @ w1 + b1, 0.0)
    return h1 @ w2 + b2


if __name__ == "__main__":
    num_tokens = 20
    embedding_dim = 8
    B, L = 2, 16  # batch=2, seq=16 -> conv output length = 9

    key = jax.random.PRNGKey(0)
    pkey, tkey = jax.random.split(key)
    params = init_params(pkey, num_tokens, embedding_dim)
    tokens = jax.random.randint(tkey, (B, L), 0, num_tokens + 1, dtype=jnp.int32)

    ref = damd_reference(tokens, params)

    # Exact f32 path: semantics check against the pure-JAX reference.
    out_f32 = jax.block_until_ready(
        damd_forward(tokens, params, compute_dtype=jnp.float32))
    assert out_f32.shape == (B, 1), out_f32.shape
    assert jnp.allclose(out_f32, ref, atol=1e-4, rtol=1e-4), (out_f32, ref)

    # Default fast path (bf16 weights/activations, f32 MXU accumulate):
    # weights are quantized, so a looser tolerance applies.
    out_bf16 = jax.block_until_ready(damd_forward(tokens, params))
    assert out_bf16.shape == (B, 1), out_bf16.shape
    assert jnp.allclose(out_bf16, ref, atol=5e-2, rtol=5e-2), (out_bf16, ref)

    print("KERNEL_OK")
</pallas_src>

<mosaic_0001>
module attributes {stable_mosaic.version = 11 : i64} {
  func.func @damd_kernel(%arg0: i32, %arg1: i32, %arg2: memref<1x8x128xi32, #tpu.memory_space<vmem>>, %arg3: memref<256x128xf32, #tpu.memory_space<vmem>>, %arg4: memref<1x128xf32, #tpu.memory_space<vmem>>, %arg5: memref<128x128xf32, #tpu.memory_space<vmem>>, %arg6: memref<1x128xf32, #tpu.memory_space<vmem>>, %arg7: memref<128x128xf32, #tpu.memory_space<vmem>>, %arg8: memref<1x128xf32, #tpu.memory_space<vmem>>, %arg9: memref<8x128xf32, #tpu.memory_space<vmem>>, %arg10: memref<8x128xf32, #tpu.memory_space<vmem>>) attributes {dimension_semantics = [#tpu.dimension_semantics<parallel>, #tpu.dimension_semantics<arbitrary>], iteration_bounds = array<i64: 1, 1>, scalar_prefetch = 0 : i64, scratch_operands = 1 : i64, tpu.core_type = #tpu.core_type<tc>, window_params = [{transform_indices = @transform_0, window_bounds = array<i64: 1, 8, 128>}, {pipeline_mode = #tpu.pipeline_mode<synchronous>, transform_indices = @transform_1, window_bounds = array<i64: 256, 128>}, {pipeline_mode = #tpu.pipeline_mode<synchronous>, transform_indices = @transform_2, window_bounds = array<i64: 1, 128>}, {pipeline_mode = #tpu.pipeline_mode<synchronous>, transform_indices = @transform_3, window_bounds = array<i64: 128, 128>}, {pipeline_mode = #tpu.pipeline_mode<synchronous>, transform_indices = @transform_4, window_bounds = array<i64: 1, 128>}, {pipeline_mode = #tpu.pipeline_mode<synchronous>, transform_indices = @transform_5, window_bounds = array<i64: 128, 128>}, {pipeline_mode = #tpu.pipeline_mode<synchronous>, transform_indices = @transform_6, window_bounds = array<i64: 1, 128>}, {transform_indices = @transform_7, window_bounds = array<i64: 8, 128>}]} {
    %c0_i32 = arith.constant 0 : i32
    %0 = arith.cmpi eq, %arg1, %c0_i32 : i32
    %1 = arith.extui %0 : i1 to i32
    %c0_i32_0 = arith.constant 0 : i32
    %2 = arith.cmpi ne, %1, %c0_i32_0 : i32
    scf.if %2 {
      %cst_13 = arith.constant 0.000000e+00 : f32
      %78 = vector.broadcast %cst_13 : f32 to vector<8x128xf32>
      %c0_14 = arith.constant 0 : index
      %c0_15 = arith.constant 0 : index
      %79 = vector.load %arg10[%c0_14, %c0_15] : memref<8x128xf32, #tpu.memory_space<vmem>>, vector<8x128xf32>
      tpu.vector_store %arg10[%c0_14, %c0_15], %78 {strides = array<i32>} : memref<8x128xf32, #tpu.memory_space<vmem>>, vector<8x128xf32>,
    } else {
    }
    %c0 = arith.constant 0 : index
    %c0_1 = arith.constant 0 : index
    %c0_2 = arith.constant 0 : index
    %3 = vector.load %arg2[%c0, %c0_1, %c0_2] : memref<1x8x128xi32, #tpu.memory_space<vmem>>, vector<1x8x128xi32>
    %4 = vector.shape_cast %3 : vector<1x8x128xi32> to vector<8x128xi32>
    %5 = tpu.iota {dimensions = array<i32: 2>} : vector<8x16x256xi32>
    %6 = vector.extract_strided_slice %4 {offsets = [0, 0], sizes = [8, 16], strides = [1, 1]} : vector<8x128xi32> to vector<8x16xi32>
    %7 = vector.shape_cast %6 : vector<8x16xi32> to vector<8x16x1xi32>
    %c0_i32_3 = arith.constant 0 : i32
    %8 = vector.broadcast %c0_i32_3 : i32 to vector<8x16x1xi32>
    %9 = arith.addi %7, %8 : vector<8x16x1xi32>
    %10 = vector.broadcast %9 : vector<8x16x1xi32> to vector<8x16x256xi32>
    %11 = arith.cmpi eq, %5, %10 : vector<8x16x256xi32>
    %12 = vector.extract_strided_slice %4 {offsets = [0, 1], sizes = [8, 16], strides = [1, 1]} : vector<8x128xi32> to vector<8x16xi32>
    %13 = vector.shape_cast %12 : vector<8x16xi32> to vector<8x16x1xi32>
    %c32_i32 = arith.constant 32 : i32
    %14 = vector.broadcast %c32_i32 : i32 to vector<8x16x1xi32>
    %15 = arith.addi %13, %14 : vector<8x16x1xi32>
    %16 = vector.broadcast %15 : vector<8x16x1xi32> to vector<8x16x256xi32>
    %17 = arith.cmpi eq, %5, %16 : vector<8x16x256xi32>
    %18 = arith.ori %11, %17 : vector<8x16x256xi1>
    %19 = vector.extract_strided_slice %4 {offsets = [0, 2], sizes = [8, 16], strides = [1, 1]} : vector<8x128xi32> to vector<8x16xi32>
    %20 = vector.shape_cast %19 : vector<8x16xi32> to vector<8x16x1xi32>
    %c64_i32 = arith.constant 64 : i32
    %21 = vector.broadcast %c64_i32 : i32 to vector<8x16x1xi32>
    %22 = arith.addi %20, %21 : vector<8x16x1xi32>
    %23 = vector.broadcast %22 : vector<8x16x1xi32> to vector<8x16x256xi32>
    %24 = arith.cmpi eq, %5, %23 : vector<8x16x256xi32>
    %25 = arith.ori %18, %24 : vector<8x16x256xi1>
    %26 = vector.extract_strided_slice %4 {offsets = [0, 3], sizes = [8, 16], strides = [1, 1]} : vector<8x128xi32> to vector<8x16xi32>
    %27 = vector.shape_cast %26 : vector<8x16xi32> to vector<8x16x1xi32>
    %c96_i32 = arith.constant 96 : i32
    %28 = vector.broadcast %c96_i32 : i32 to vector<8x16x1xi32>
    %29 = arith.addi %27, %28 : vector<8x16x1xi32>
    %30 = vector.broadcast %29 : vector<8x16x1xi32> to vector<8x16x256xi32>
    %31 = arith.cmpi eq, %5, %30 : vector<8x16x256xi32>
    %32 = arith.ori %25, %31 : vector<8x16x256xi1>
    %33 = vector.extract_strided_slice %4 {offsets = [0, 4], sizes = [8, 16], strides = [1, 1]} : vector<8x128xi32> to vector<8x16xi32>
    %34 = vector.shape_cast %33 : vector<8x16xi32> to vector<8x16x1xi32>
    %c128_i32 = arith.constant 128 : i32
    %35 = vector.broadcast %c128_i32 : i32 to vector<8x16x1xi32>
    %36 = arith.addi %34, %35 : vector<8x16x1xi32>
    %37 = vector.broadcast %36 : vector<8x16x1xi32> to vector<8x16x256xi32>
    %38 = arith.cmpi eq, %5, %37 : vector<8x16x256xi32>
    %39 = arith.ori %32, %38 : vector<8x16x256xi1>
    %40 = vector.extract_strided_slice %4 {offsets = [0, 5], sizes = [8, 16], strides = [1, 1]} : vector<8x128xi32> to vector<8x16xi32>
    %41 = vector.shape_cast %40 : vector<8x16xi32> to vector<8x16x1xi32>
    %c160_i32 = arith.constant 160 : i32
    %42 = vector.broadcast %c160_i32 : i32 to vector<8x16x1xi32>
    %43 = arith.addi %41, %42 : vector<8x16x1xi32>
    %44 = vector.broadcast %43 : vector<8x16x1xi32> to vector<8x16x256xi32>
    %45 = arith.cmpi eq, %5, %44 : vector<8x16x256xi32>
    %46 = arith.ori %39, %45 : vector<8x16x256xi1>
    %47 = vector.extract_strided_slice %4 {offsets = [0, 6], sizes = [8, 16], strides = [1, 1]} : vector<8x128xi32> to vector<8x16xi32>
    %48 = vector.shape_cast %47 : vector<8x16xi32> to vector<8x16x1xi32>
    %c192_i32 = arith.constant 192 : i32
    %49 = vector.broadcast %c192_i32 : i32 to vector<8x16x1xi32>
    %50 = arith.addi %48, %49 : vector<8x16x1xi32>
    %51 = vector.broadcast %50 : vector<8x16x1xi32> to vector<8x16x256xi32>
    %52 = arith.cmpi eq, %5, %51 : vector<8x16x256xi32>
    %53 = arith.ori %46, %52 : vector<8x16x256xi1>
    %54 = vector.extract_strided_slice %4 {offsets = [0, 7], sizes = [8, 16], strides = [1, 1]} : vector<8x128xi32> to vector<8x16xi32>
    %55 = vector.shape_cast %54 : vector<8x16xi32> to vector<8x16x1xi32>
    %c224_i32 = arith.constant 224 : i32
    %56 = vector.broadcast %c224_i32 : i32 to vector<8x16x1xi32>
    %57 = arith.addi %55, %56 : vector<8x16x1xi32>
    %58 = vector.broadcast %57 : vector<8x16x1xi32> to vector<8x16x256xi32>
    %59 = arith.cmpi eq, %5, %58 : vector<8x16x256xi32>
    %60 = arith.ori %53, %59 : vector<8x16x256xi1>
    %61 = arith.extui %60 : vector<8x16x256xi1> to vector<8x16x256xi32>
    %62 = arith.sitofp %61 : vector<8x16x256xi32> to vector<8x16x256xf32>
    %63 = vector.shape_cast %62 : vector<8x16x256xf32> to vector<128x256xf32>
    %c0_4 = arith.constant 0 : index
    %c0_5 = arith.constant 0 : index
    %64 = vector.load %arg3[%c0_4, %c0_5] : memref<256x128xf32, #tpu.memory_space<vmem>>, vector<256x128xf32>
    %cst = arith.constant dense<0.000000e+00> : vector<128x128xf32>
    %65 = tpu.matmul %63, %64, %cst {dimension_numbers = #tpu.dot_dimension_numbers<[1], [0], [0], [1], [0, 0, 1, 1], [], []>} : vector<128x256xf32>, vector<256x128xf32>, vector<128x128xf32> -> vector<128x128xf32>
    %c0_6 = arith.constant 0 : index
    %c0_7 = arith.constant 0 : index
    %66 = vector.load %arg4[%c0_6, %c0_7] : memref<1x128xf32, #tpu.memory_space<vmem>>, vector<1x128xf32>
    %67 = vector.broadcast %66 : vector<1x128xf32> to vector<128x128xf32>
    %68 = arith.addf %65, %67 : vector<128x128xf32>
    %cst_8 = arith.constant 0.000000e+00 : f32
    %69 = vector.broadcast %cst_8 : f32 to vector<128x128xf32>
    %70 = arith.maximumf %68, %69 : vector<128x128xf32>
    %71 = vector.shape_cast %70 : vector<128x128xf32> to vector<8x16x128xf32>
    %c0_i32_9 = arith.constant 0 : i32
    %72 = arith.cmpi slt, %arg1, %c0_i32_9 : i32
    %73 = arith.extui %72 : i1 to i32
    %c0_i32_10 = arith.constant 0 : i32
    %74 = arith.cmpi ne, %73, %c0_i32_10 : i32
    scf.if %74 {
      %c0_13 = arith.constant 0 : index
      %c0_14 = arith.constant 0 : index
      %78 = vector.load %arg10[%c0_13, %c0_14] : memref<8x128xf32, #tpu.memory_space<vmem>>, vector<8x128xf32>
      %cst_15 = arith.constant dense<0xFF800000> : vector<8x128xf32>
      %79 = vector.multi_reduction <maximumf>, %71, %cst_15 [1] : vector<8x16x128xf32> to vector<8x128xf32>
      %80 = arith.maximumf %78, %79 : vector<8x128xf32>
      %c0_16 = arith.constant 0 : index
      %c0_17 = arith.constant 0 : index
      %81 = vector.load %arg10[%c0_16, %c0_17] : memref<8x128xf32, #tpu.memory_space<vmem>>, vector<8x128xf32>
      tpu.vector_store %arg10[%c0_16, %c0_17], %80 {strides = array<i32>} : memref<8x128xf32, #tpu.memory_space<vmem>>, vector<8x128xf32>,
    } else {
    }
    %c0_i32_11 = arith.constant 0 : i32
    %75 = arith.cmpi eq, %arg1, %c0_i32_11 : i32
    %76 = arith.extui %75 : i1 to i32
    %c0_i32_12 = arith.constant 0 : i32
    %77 = arith.cmpi ne, %76, %c0_i32_12 : i32
    scf.if %77 {
      %78 = tpu.iota {dimensions = array<i32: 1>} : vector<1x16x1xi32>
      %c16_i32 = arith.constant 16 : i32
      %79 = arith.muli %arg1, %c16_i32 : i32
      %80 = vector.broadcast %79 : i32 to vector<1x16x1xi32>
      %81 = arith.addi %78, %80 : vector<1x16x1xi32>
      %c9_i32 = arith.constant 9 : i32
      %82 = vector.broadcast %c9_i32 : i32 to vector<1x16x1xi32>
      %83 = arith.cmpi slt, %81, %82 : vector<1x16x1xi32>
      %cst_13 = arith.constant 0.000000e+00 : f32
      %84 = vector.shape_cast %83 : vector<1x16x1xi1> to vector<1x16x1xi1>
      %85 = vector.broadcast %84 : vector<1x16x1xi1> to vector<8x16x128xi1>
      %86 = vector.broadcast %cst_13 : f32 to vector<8x16x128xf32>
      %87 = arith.select %85, %71, %86 : vector<8x16x128xi1>, vector<8x16x128xf32>
      %c0_14 = arith.constant 0 : index
      %c0_15 = arith.constant 0 : index
      %88 = vector.load %arg10[%c0_14, %c0_15] : memref<8x128xf32, #tpu.memory_space<vmem>>, vector<8x128xf32>
      %cst_16 = arith.constant dense<0xFF800000> : vector<8x128xf32>
      %89 = vector.multi_reduction <maximumf>, %87, %cst_16 [1] : vector<8x16x128xf32> to vector<8x128xf32>
      %90 = arith.maximumf %88, %89 : vector<8x128xf32>
      %c0_17 = arith.constant 0 : index
      %c0_18 = arith.constant 0 : index
      %91 = vector.load %arg5[%c0_17, %c0_18] : memref<128x128xf32, #tpu.memory_space<vmem>>, vector<128x128xf32>
      %cst_19 = arith.constant dense<0.000000e+00> : vector<8x128xf32>
      %92 = tpu.matmul %90, %91, %cst_19 {dimension_numbers = #tpu.dot_dimension_numbers<[1], [0], [0], [1], [0, 0, 1, 1], [], []>} : vector<8x128xf32>, vector<128x128xf32>, vector<8x128xf32> -> vector<8x128xf32>
      %c0_20 = arith.constant 0 : index
      %c0_21 = arith.constant 0 : index
      %93 = vector.load %arg6[%c0_20, %c0_21] : memref<1x128xf32, #tpu.memory_space<vmem>>, vector<1x128xf32>
      %94 = vector.broadcast %93 : vector<1x128xf32> to vector<8x128xf32>
      %95 = arith.addf %92, %94 : vector<8x128xf32>
      %cst_22 = arith.constant 0.000000e+00 : f32
      %96 = vector.broadcast %cst_22 : f32 to vector<8x128xf32>
      %97 = arith.maximumf %95, %96 : vector<8x128xf32>
      %c0_23 = arith.constant 0 : index
      %c0_24 = arith.constant 0 : index
      %98 = vector.load %arg7[%c0_23, %c0_24] : memref<128x128xf32, #tpu.memory_space<vmem>>, vector<128x128xf32>
      %cst_25 = arith.constant dense<0.000000e+00> : vector<8x128xf32>
      %99 = tpu.matmul %97, %98, %cst_25 {dimension_numbers = #tpu.dot_dimension_numbers<[1], [0], [0], [1], [0, 0, 1, 1], [], []>} : vector<8x128xf32>, vector<128x128xf32>, vector<8x128xf32> -> vector<8x128xf32>
      %c0_26 = arith.constant 0 : index
      %c0_27 = arith.constant 0 : index
      %100 = vector.load %arg8[%c0_26, %c0_27] : memref<1x128xf32, #tpu.memory_space<vmem>>, vector<1x128xf32>
      %101 = vector.broadcast %100 : vector<1x128xf32> to vector<8x128xf32>
      %102 = arith.addf %99, %101 : vector<8x128xf32>
      %c0_28 = arith.constant 0 : index
      %c0_29 = arith.constant 0 : index
      %103 = vector.load %arg9[%c0_28, %c0_29] : memref<8x128xf32, #tpu.memory_space<vmem>>, vector<8x128xf32>
      tpu.vector_store %arg9[%c0_28, %c0_29], %102 {strides = array<i32>} : memref<8x128xf32, #tpu.memory_space<vmem>>, vector<8x128xf32>,
    } else {
    }
    return
  }
  func.func @transform_0(%arg0: i32, %arg1: i32) -> (i32, i32, i32) {
    %c0_i32 = arith.constant 0 : i32
    %c0_i32_0 = arith.constant 0 : i32
    return %arg1, %arg0, %c0_i32 : i32, i32, i32
  }
  func.func @transform_1(%arg0: i32, %arg1: i32) -> (i32, i32) {
    %c0_i32 = arith.constant 0 : i32
    %c0_i32_0 = arith.constant 0 : i32
    %c0_i32_1 = arith.constant 0 : i32
    return %c0_i32, %c0_i32_0 : i32, i32
  }
  func.func @transform_2(%arg0: i32, %arg1: i32) -> (i32, i32) {
    %c0_i32 = arith.constant 0 : i32
    %c0_i32_0 = arith.constant 0 : i32
    %c0_i32_1 = arith.constant 0 : i32
    return %c0_i32, %c0_i32_0 : i32, i32
  }
  func.func @transform_3(%arg0: i32, %arg1: i32) -> (i32, i32) {
    %c0_i32 = arith.constant 0 : i32
    %c0_i32_0 = arith.constant 0 : i32
    %c0_i32_1 = arith.constant 0 : i32
    return %c0_i32, %c0_i32_0 : i32, i32
  }
  func.func @transform_4(%arg0: i32, %arg1: i32) -> (i32, i32) {
    %c0_i32 = arith.constant 0 : i32
    %c0_i32_0 = arith.constant 0 : i32
    %c0_i32_1 = arith.constant 0 : i32
    return %c0_i32, %c0_i32_0 : i32, i32
  }
  func.func @transform_5(%arg0: i32, %arg1: i32) -> (i32, i32) {
    %c0_i32 = arith.constant 0 : i32
    %c0_i32_0 = arith.constant 0 : i32
    %c0_i32_1 = arith.constant 0 : i32
    return %c0_i32, %c0_i32_0 : i32, i32
  }
  func.func @transform_6(%arg0: i32, %arg1: i32) -> (i32, i32) {
    %c0_i32 = arith.constant 0 : i32
    %c0_i32_0 = arith.constant 0 : i32
    %c0_i32_1 = arith.constant 0 : i32
    return %c0_i32, %c0_i32_0 : i32, i32
  }
  func.func @transform_7(%arg0: i32, %arg1: i32) -> (i32, i32) {
    %c0_i32 = arith.constant 0 : i32
    %c0_i32_0 = arith.constant 0 : i32
    return %arg0, %c0_i32 : i32, i32
  }
}

</mosaic_0001>

<bundles_post_ra>
// kernel: tpu_custom_call.1
= control target key start
LH: loop header
LB: loop body
LE: loop exit
PB: predicated region body
PF: predicated region fallthrough
CT: control target
= control target key end

     0   :  { %12 = vsyncpa [#allocation4], 0  ;;  %s2979_s0 = inlined_call_operand.hbm [shape: s32[1,8,128], index: 0, kind: input, shape index: {}]   ;;  %s2980_s1 = inlined_call_operand.hbm [shape: f32[256,128], index: 1, kind: input, shape index: {}]   ;;  %s2981_s2 = inlined_call_operand.vmem [shape: f32[1,128], index: 2, kind: input, shape index: {}]   ;;  %s2982_s3 = inlined_call_operand.hbm [shape: f32[128,128], index: 3, kind: input, shape index: {}]   ;;  %s2983_s4 = inlined_call_operand.vmem [shape: f32[1,128], index: 4, kind: input, shape index: {}]   ;;  %s2984_s5 = inlined_call_operand.hbm [shape: f32[128,128], index: 5, kind: input, shape index: {}]   ;;  %s2985_s6 = inlined_call_operand.vmem [shape: f32[1,128], index: 6, kind: input, shape index: {}]   ;;  %s2986_s7 = inlined_call_operand.hbm [shape: f32[8,128], index: 7, kind: output, shape index: {}]  }
   0x1   :  { %13 = vsyncpa [#allocation7], 0 }
   0x2   :  { %14 = vsyncpa [#allocation10], 0 }
   0x3   :  { %15 = vsyncpa [#allocation5], 0  ;;  %s2312_s24 = smov [#allocation6]   ;;  %s2194_s28 = scalar_lea.hbm %s2980_s1, 4096 }
   0x4   :  { %s31_s25 = sshll.u32 %s2312_s24, 4  ;;  %p2195_p0 = scmp.ne.s32.totalorder %s2980_s1, %s2194_s28  ;;  %s32_s25 = int_to_ptr.vmem [resolvable:$true] %s31_s25 }
   0x5   :  { %p2198_p1 = scmp.lt.u32.totalorder %s2194_s28, %s2980_s1 }
   0x7   :  { %p2200_p2 = pnand %p2198_p1, %p2195_p0 }
   0x9   :  { %2203 = shalt.err (!%p2200_p2)
}
   0xa   :  { %s2204_s10 = scalar_lea.vmem %s32_s25, 4096  ;;  %p2209_p4 = scmp.lt.s32.totalorder %s32_s25, %s32_s25 }
   0xb   :  { %p2205_p3 = scmp.ne.s32.totalorder %s32_s25, %s2204_s10  ;;  %p2210_p5 = scmp.lt.s32.totalorder %s2204_s10, %s2204_s10 }
   0xd   :  { %p2211_p6 = por %p2210_p5, %p2209_p4 }
   0xf   :  { %p2212_p7 = pnand %p2211_p6, %p2205_p3 }
  0x11   :  { %2215 = shalt.err (!%p2212_p7)
}
  0x12   :  { %s2313_s11 = smov 128   ;;  %s2314_s12 = smov 8  }
  0x13   :  { %37 = dma.hbm_to_vmem [thread:$0]  %s2980_s1, 4096, %s32_s25, [#allocation7], %s2313_s11, %s2313_s11, %s2314_s12  }
  0x14   :  { %s2315_s15 = smov [#allocation3]   ;;  %s2316_s17 = smov [#allocation8]  }
  0x15   :  { %s22_s16 = sshll.u32 %s2315_s15, 4  ;;  %s45_s18 = sshll.u32 %s2316_s17, 4  ;;  %s23_s16 = int_to_ptr.vmem [resolvable:$true] %s22_s16  ;;  %s46_s18 = int_to_ptr.vmem [resolvable:$true] %s45_s18 }
  0x16   :  { %s2216_s21 = scalar_lea.hbm %s2979_s0, 128 }
  0x17   :  { %p2217_p8 = scmp.ne.s32.totalorder %s2979_s0, %s2216_s21  ;;  %p2220_p9 = scmp.lt.u32.totalorder %s2216_s21, %s2979_s0 }
  0x19   :  { %p2222_p10 = pnand %p2220_p9, %p2217_p8 }
  0x1b   :  { %2225 = shalt.err (!%p2222_p10)
}
  0x1c   :  { %s2226_s1 = scalar_lea.vmem %s23_s16, 128  ;;  %p2231_p12 = scmp.lt.s32.totalorder %s23_s16, %s23_s16 }
  0x1d   :  { %p2227_p11 = scmp.ne.s32.totalorder %s23_s16, %s2226_s1  ;;  %p2232_p13 = scmp.lt.s32.totalorder %s2226_s1, %s2226_s1 }
  0x1f   :  { %p2233_p0 = por %p2232_p13, %p2231_p12 }
  0x21   :  { %p2234_p1 = pnand %p2233_p0, %p2227_p11 }
  0x23   :  { %2237 = shalt.err (!%p2234_p1)
}
  0x24   :  { %25 = dma.hbm_to_vmem [thread:$0]  %s2979_s0, 128, %s23_s16, [#allocation4]  }
  0x25   :  { %s2238_s30 = scalar_lea.hbm %s2982_s3, 2048 }
  0x26   :  { %p2239_p2 = scmp.ne.s32.totalorder %s2982_s3, %s2238_s30  ;;  %p2242_p3 = scmp.lt.u32.totalorder %s2238_s30, %s2982_s3 }
  0x28   :  { %p2244_p4 = pnand %p2242_p3, %p2239_p2 }
  0x2a   :  { %2247 = shalt.err (!%p2244_p4)
}
  0x2b   :  { %s2248_s14 = scalar_lea.vmem %s46_s18, 2048  ;;  %p2253_p6 = scmp.lt.s32.totalorder %s46_s18, %s46_s18 }
  0x2c   :  { %p2249_p5 = scmp.ne.s32.totalorder %s46_s18, %s2248_s14  ;;  %p2254_p7 = scmp.lt.s32.totalorder %s2248_s14, %s2248_s14 }
  0x2e   :  { %p2255_p8 = por %p2254_p7, %p2253_p6 }
  0x30   :  { %p2256_p9 = pnand %p2255_p8, %p2249_p5 }
  0x32   :  { %2259 = shalt.err (!%p2256_p9)
}
  0x33   :  { %51 = dma.hbm_to_vmem [thread:$0]  %s2982_s3, 2048, %s46_s18, [#allocation7], %s2313_s11, %s2313_s11, %s2314_s12  }
  0x34   :  { %s2317_s16 = smov [#allocation9]   ;;  %s2260_s21 = scalar_lea.hbm %s2984_s5, 2048 }
  0x35   :  { %s59_s17 = sshll.u32 %s2317_s16, 4  ;;  %p2261_p10 = scmp.ne.s32.totalorder %s2984_s5, %s2260_s21  ;;  %s60_s17 = int_to_ptr.vmem [resolvable:$true] %s59_s17 }
  0x36   :  { %p2264_p11 = scmp.lt.u32.totalorder %s2260_s21, %s2984_s5 }
  0x38   :  { %p2266_p12 = pnand %p2264_p11, %p2261_p10 }
  0x3a   :  { %2269 = shalt.err (!%p2266_p12)
}
  0x3b   :  { %s2270_s1 = scalar_lea.vmem %s60_s17, 2048  ;;  %p2275_p0 = scmp.lt.s32.totalorder %s60_s17, %s60_s17 }
  0x3c   :  { %p2271_p13 = scmp.ne.s32.totalorder %s60_s17, %s2270_s1  ;;  %p2276_p1 = scmp.lt.s32.totalorder %s2270_s1, %s2270_s1 }
  0x3e   :  { %p2277_p2 = por %p2276_p1, %p2275_p0 }
  0x40   :  { %p2278_p3 = pnand %p2277_p2, %p2271_p13 }
  0x42   :  { %2281 = shalt.err (!%p2278_p3)
}
  0x43   :  { %65 = dma.hbm_to_vmem [thread:$0]  %s2984_s5, 2048, %s60_s17, [#allocation10], %s2313_s11, %s2313_s11, %s2314_s12  }
  0x44   :  { %2304 = dma.done.wait [#allocation4], 128  }
  0x45   :  { %2305 = vsyncadd [#allocation4], 4294967168 }
  0x46   :  { %2306 = dma.done.wait [#allocation7], 6144  }
  0x47   :  { %2307 = vsyncadd [#allocation7], 4294961152 }
  0x48   :  { %2308 = dma.done.wait [#allocation10], 2048  }
  0x49   :  { %2309 = vsyncadd [#allocation10], 4294965248  ;;  %v86_v0 = vlaneseq  ;;  %v2423_v3 = vld [vmem:[#allocation3] sm:$0xff]  ;;  %v1297_v4 = vld [vmem:[#allocation6 + $0x80] sm:$0xff]  ;;  %s2321_s28 = smov [#allocation11]  }
  0x4a   :  { %v1298_v5 = vld [vmem:[#allocation6 + $0x88] sm:$0xff]  ;;  %v1281_v7 = vld [vmem:[#allocation6] sm:$0xff]  ;;  %v1299_v9 = vld [vmem:[#allocation6 + $0x90] sm:$0xff]  ;;  %s1874_s29 = sshll.u32 %s2321_s28, 4  ;;  %s1875_s29 = int_to_ptr.vmem [resolvable:$true] %s1874_s29 }
  0x4b   :  { %v2420_v1 = vshrl.u32 %v86_v0, 7  ;;  %v1282_v8 = vld [vmem:[#allocation6 + $0x8] sm:$0xff]  ;;  %v2104_v10 = vpack.c.bf16 %v1298_v5, %v1297_v4  ;;  %v1300_v12 = vld [vmem:[#allocation6 + $0x98] sm:$0xff]  ;;  %v1283_v13 = vld [vmem:[#allocation6 + $0x10] sm:$0xff]  ;;  %v2455_v63 = vand.u32 127, %v86_v0  ;;  %s2282_s30 = scalar_lea.vmem %s1875_s29, 128  ;;  %p2287_p5 = scmp.lt.s32.totalorder %s1875_s29, %s1875_s29 }
  0x4c   :  { %v2106_v11 = vpack.c.bf16 %v1282_v8, %v1281_v7  ;;  %v1284_v14 = vld [vmem:[#allocation6 + $0x18] sm:$0xff]  ;;  %v2108_v15 = vpack.c.bf16 %v1300_v12, %v1299_v9  ;;  %v1301_v16 = vld [vmem:[#allocation6 + $0xa0] sm:$0xff]  ;;  %v1302_v17 = vld [vmem:[#allocation6 + $0xa8] sm:$0xff]  ;;  %p2283_p4 = scmp.ne.s32.totalorder %s1875_s29, %s2282_s30  ;;  %p2288_p6 = scmp.lt.s32.totalorder %s2282_s30, %s2282_s30 }
  0x4d   :  { %v91_v2 = vsub.s32 0, %v2420_v1  ;;  %2105 = vmatprep.subr.bf16.mxu0 %v2104_v10  ;;  %v2110_v18 = vpack.c.bf16 %v1284_v14, %v1283_v13  ;;  %v2112_v19 = vpack.c.bf16 %v1302_v17, %v1301_v16  ;;  %v1285_v20 = vld [vmem:[#allocation6 + $0x20] sm:$0xff]  ;;  %v1286_v21 = vld [vmem:[#allocation6 + $0x28] sm:$0xff]  ;;  %v1303_v22 = vld [vmem:[#allocation6 + $0xb0] sm:$0xff]  ;;  %v102_v40 = vsub.s32 1, %v2420_v1 }
  0x4e   :  { %2107 = vmatpush3.bf16.msra.mxu0 %v2106_v11  ;;  %v1304_v23 = vld [vmem:[#allocation6 + $0xb8] sm:$0xff]  ;;  %v2114_v24 = vpack.c.bf16 %v1286_v21, %v1285_v20  ;;  %v1287_v26 = vld [vmem:[#allocation6 + $0x30] sm:$0xff]  ;;  %v1305_v28 = vld [vmem:[#allocation6 + $0xc0] sm:$0xff]  ;;  %v113_v55 = vsub.s32 2, %v2420_v1  ;;  %v124_v57 = vsub.s32 3, %v2420_v1  ;;  %v135_v59 = vsub.s32 4, %v2420_v1  ;;  %p2289_p7 = por %p2288_p6, %p2287_p5 }
  0x4f   :  { %v2426_v6 = vrot.slane %v2423_v3, %v91_v2  ;;  %2109 = vmatprep.subr.bf16.mxu0 %v2108_v15  ;;  %v2116_v25 = vpack.c.bf16 %v1304_v23, %v1303_v22  ;;  %v1288_v27 = vld [vmem:[#allocation6 + $0x38] sm:$0xff]  ;;  %v1306_v29 = vld [vmem:[#allocation6 + $0xc8] sm:$0xff]  ;;  %v1289_v32 = vld [vmem:[#allocation6 + $0x40] sm:$0xff]  ;;  %v103_v47 = vrot.slane %v2423_v3, %v102_v40 }
  0x50   :  { %v2118_v30 = vpack.c.bf16 %v1288_v27, %v1287_v26  ;;  %v2120_v31 = vpack.c.bf16 %v1306_v29, %v1305_v28  ;;  %v1290_v33 = vld [vmem:[#allocation6 + $0x48] sm:$0xff]  ;;  %v1307_v34 = vld [vmem:[#allocation6 + $0xd0] sm:$0xff]  ;;  %v1308_v35 = vld [vmem:[#allocation6 + $0xd8] sm:$0xff]  ;;  %v114_v56 = vrot.slane %v2423_v3, %v113_v55  ;;  %v125_v58 = vrot.slane %v2423_v3, %v124_v57  ;;  %p2290_p8 = pnand %p2289_p7, %p2283_p4 }
  0x51   :  { %94 = vbcast.lane.b32.xlu1 %v2426_v6, 256  ;;  %211 = vbcast.lane.b32.xlu0 %v2426_v6, 257  ;;  %v2122_v36 = vpack.c.bf16 %v1290_v33, %v1289_v32  ;;  %v2124_v37 = vpack.c.bf16 %v1308_v35, %v1307_v34  ;;  %v1291_v38 = vld [vmem:[#allocation6 + $0x50] sm:$0xff]  ;;  %v1292_v39 = vld [vmem:[#allocation6 + $0x58] sm:$0xff]  ;;  %v1309_v41 = vld [vmem:[#allocation6 + $0xe0] sm:$0xff]  ;;  %v2452_v62 = vrot.slane %v2423_v3, %v135_v59 }
  0x52   :  { %2111 = vmatpush3.bf16.msra.mxu0 %v2110_v18  ;;  %v1310_v42 = vld [vmem:[#allocation6 + $0xe8] sm:$0xff]  ;;  %v2126_v43 = vpack.c.bf16 %v1292_v39, %v1291_v38  ;;  %v1293_v45 = vld [vmem:[#allocation6 + $0x60] sm:$0xff]  ;;  %v1311_v48 = vld [vmem:[#allocation6 + $0xf0] sm:$0xff] }
  0x53   :  { %2113 = vmatprep.subr.bf16.mxu0 %v2112_v19  ;;  %v2128_v44 = vpack.c.bf16 %v1310_v42, %v1309_v41  ;;  %v1294_v46 = vld [vmem:[#allocation6 + $0x68] sm:$0xff]  ;;  %v1312_v49 = vld [vmem:[#allocation6 + $0xf8] sm:$0xff]  ;;  %v1295_v52 = vld [vmem:[#allocation6 + $0x70] sm:$0xff] }
  0x54   :  { %v2130_v50 = vpack.c.bf16 %v1294_v46, %v1293_v45  ;;  %v2132_v51 = vpack.c.bf16 %v1312_v49, %v1311_v48  ;;  %v1296_v53 = vld [vmem:[#allocation6 + $0x78] sm:$0xff] }
  0x55   :  { %499 = vbcast.lane.b32.xlu1 %v2426_v6, 259  ;;  %355 = vbcast.lane.b32.xlu0 %v2426_v6, 258  ;;  %v2134_v54 = vpack.c.bf16 %v1296_v53, %v1295_v52 }
  0x56   :  { %2115 = vmatpush3.bf16.msra.mxu0 %v2114_v24 }
  0x57   :  { %2117 = vmatprep.subr.bf16.mxu0 %v2116_v25  ;;  %v2318_v25 = vmov 0.0  }
  0x59   :  { %215 = vbcast.lane.b32.xlu1 %v2426_v6, 265  ;;  %643 = vbcast.lane.b32.xlu0 %v2426_v6, 260 }
  0x5a   :  { %2119 = vmatpush3.bf16.msra.mxu0 %v2118_v30 }
  0x5b   :  { %2121 = vmatprep.subr.bf16.mxu0 %v2120_v31  ;;  %v146_v31 = vsub.s32 5, %v2420_v1 }
  0x5d   :  { %359 = vbcast.lane.b32.xlu1 %v2426_v6, 266  ;;  %787 = vbcast.lane.b32.xlu0 %v2426_v6, 261 }
  0x5e   :  { %2123 = vmatpush3.bf16.msra.mxu0 %v2122_v36  ;;  %v2503_v36 = vrot.slane %v2423_v3, %v146_v31 }
  0x5f   :  { %2125 = vmatprep.subr.bf16.mxu0 %v2124_v37 }
  0x61   :  { %98 = vbcast.lane.b32.xlu1 %v2426_v6, 264  ;;  %931 = vbcast.lane.b32.xlu0 %v2426_v6, 262 }
  0x62   :  { %2127 = vmatpush3.bf16.msra.mxu0 %v2126_v43 }
  0x63   :  { %2129 = vmatprep.subr.bf16.mxu0 %v2128_v44 }
  0x65   :  { %1075 = vbcast.lane.b32.xlu1 %v2426_v6, 263  ;;  %503 = vbcast.lane.b32.xlu0 %v2426_v6, 267 }
  0x66   :  { %2131 = vmatpush3.bf16.msra.mxu0 %v2130_v50 }
  0x67   :  { %2133 = vmatprep.subr.bf16.mxu0 %v2132_v51 }
  0x69   :  { %219 = vbcast.lane.b32.xlu1 %v103_v47, 257  ;;  %647 = vbcast.lane.b32.xlu0 %v2426_v6, 268 }
  0x6a   :  { %2135 = vmatpush3.bf16.msra.mxu0 %v2134_v54 }
  0x6d   :  { %363 = vbcast.lane.b32.xlu1 %v103_v47, 258  ;;  %791 = vbcast.lane.b32.xlu0 %v2426_v6, 269 }
  0x71   :  { %105 = vbcast.lane.b32.xlu1 %v103_v47, 256  ;;  %935 = vbcast.lane.b32.xlu0 %v2426_v6, 270 }
  0x75   :  { %1079 = vbcast.lane.b32.xlu1 %v2426_v6, 271  ;;  %507 = vbcast.lane.b32.xlu0 %v103_v47, 259  ;;  %v2459_v6 = vadd.s32 128, %v2455_v63 }
  0x79   :  { %223 = vbcast.lane.b32.xlu1 %v103_v47, 265  ;;  %651 = vbcast.lane.b32.xlu0 %v103_v47, 260 }
  0x7d   :  { %367 = vbcast.lane.b32.xlu1 %v103_v47, 266  ;;  %795 = vbcast.lane.b32.xlu0 %v103_v47, 261 }
  0x81   :  { %109 = vbcast.lane.b32.xlu1 %v103_v47, 264  ;;  %939 = vbcast.lane.b32.xlu0 %v103_v47, 262 }
  0x85   :  { %1083 = vbcast.lane.b32.xlu1 %v103_v47, 263  ;;  %511 = vbcast.lane.b32.xlu0 %v103_v47, 267 }
  0x89   :  { %227 = vbcast.lane.b32.xlu1 %v114_v56, 257  ;;  %655 = vbcast.lane.b32.xlu0 %v103_v47, 268 }
  0x8d   :  { %371 = vbcast.lane.b32.xlu1 %v114_v56, 258  ;;  %799 = vbcast.lane.b32.xlu0 %v103_v47, 269 }
  0x91   :  { %116 = vbcast.lane.b32.xlu1 %v114_v56, 256  ;;  %943 = vbcast.lane.b32.xlu0 %v103_v47, 270 }
  0x95   :  { %1087 = vbcast.lane.b32.xlu1 %v103_v47, 271  ;;  %515 = vbcast.lane.b32.xlu0 %v114_v56, 259 }
  0x99   :  { %231 = vbcast.lane.b32.xlu1 %v114_v56, 265  ;;  %659 = vbcast.lane.b32.xlu0 %v114_v56, 260 }
  0x9d   :  { %375 = vbcast.lane.b32.xlu1 %v114_v56, 266  ;;  %803 = vbcast.lane.b32.xlu0 %v114_v56, 261 }
  0xa1   :  { %120 = vbcast.lane.b32.xlu1 %v114_v56, 264  ;;  %947 = vbcast.lane.b32.xlu0 %v114_v56, 262 }
  0xa5   :  { %1091 = vbcast.lane.b32.xlu1 %v114_v56, 263  ;;  %519 = vbcast.lane.b32.xlu0 %v114_v56, 267 }
  0xa9   :  { %235 = vbcast.lane.b32.xlu1 %v125_v58, 257  ;;  %663 = vbcast.lane.b32.xlu0 %v114_v56, 268 }
  0xad   :  { %379 = vbcast.lane.b32.xlu1 %v125_v58, 258  ;;  %807 = vbcast.lane.b32.xlu0 %v114_v56, 269 }
  0xb1   :  { %127 = vbcast.lane.b32.xlu1 %v125_v58, 256  ;;  %951 = vbcast.lane.b32.xlu0 %v114_v56, 270 }
  0xb5   :  { %1095 = vbcast.lane.b32.xlu1 %v114_v56, 271  ;;  %523 = vbcast.lane.b32.xlu0 %v125_v58, 259 }
  0xb9   :  { %239 = vbcast.lane.b32.xlu1 %v125_v58, 265  ;;  %667 = vbcast.lane.b32.xlu0 %v125_v58, 260 }
  0xbd   :  { %383 = vbcast.lane.b32.xlu1 %v125_v58, 266  ;;  %811 = vbcast.lane.b32.xlu0 %v125_v58, 261 }
  0xc1   :  { %131 = vbcast.lane.b32.xlu1 %v125_v58, 264  ;;  %955 = vbcast.lane.b32.xlu0 %v125_v58, 262 }
  0xc3   :  { %v95_v60 = vpop.permute.xlu1 %94  ;;  %v212_v61 = vpop.permute.xlu0 %211 }
  0xc4   :  { %v273_v5 = vadd.s32 32, %v212_v61  ;;  %vm177_vm0 = vcmp.eq.s32.totalorder %v2455_v63, %v95_v60  ;;  %vm178_vm2 = vcmp.eq.s32.totalorder %v2459_v6, %v95_v60 }
  0xc5   :  { %1099 = vbcast.lane.b32.xlu1 %v125_v58, 263  ;;  %527 = vbcast.lane.b32.xlu0 %v125_v58, 267 }
  0xc6   :  { %vm289_vm1 = vcmp.eq.s32.totalorder %v2455_v63, %v273_v5  ;;  %vm290_vm3 = vcmp.eq.s32.totalorder %v2459_v6, %v273_v5 }
  0xc7   :  { %v500_v2 = vpop.permute.xlu1 %499  ;;  %v356_v4 = vpop.permute.xlu0 %355  ;;  %vm321_vm5 = vmor %vm177_vm0, %vm289_vm1 }
  0xc8   :  { %v417_v7 = vadd.s32 64, %v356_v4  ;;  %v561_v0 = vadd.s32 96, %v500_v2  ;;  %vm322_vm7 = vmor %vm178_vm2, %vm290_vm3 }
  0xc9   :  { %243 = vbcast.lane.b32.xlu1 %v2452_v62, 257  ;;  %671 = vbcast.lane.b32.xlu0 %v125_v58, 268 }
  0xca   :  { %vm433_vm4 = vcmp.eq.s32.totalorder %v2455_v63, %v417_v7  ;;  %vm434_vm6 = vcmp.eq.s32.totalorder %v2459_v6, %v417_v7  ;;  %vm577_vm8 = vcmp.eq.s32.totalorder %v2455_v63, %v561_v0  ;;  %vm578_vm10 = vcmp.eq.s32.totalorder %v2459_v6, %v561_v0 }
  0xcb   :  { %v216_v8 = vpop.permute.xlu1 %215  ;;  %v644_v9 = vpop.permute.xlu0 %643  ;;  %vm465_vm9 = vmor %vm321_vm5, %vm433_vm4 }
  0xcc   :  { %v705_v12 = vadd.s32 128, %v644_v9  ;;  %vm466_vm11 = vmor %vm322_vm7, %vm434_vm6  ;;  %v274_v20 = vadd.s32 32, %v216_v8  ;;  %v157_v8 = vsub.s32 6, %v2420_v1 }
  0xcd   :  { %387 = vbcast.lane.b32.xlu1 %v2452_v62, 258  ;;  %815 = vbcast.lane.b32.xlu0 %v125_v58, 269  ;;  %vm609_vm13 = vmor %vm465_vm9, %vm577_vm8 }
  0xce   :  { %vm721_vm12 = vcmp.eq.s32.totalorder %v2455_v63, %v705_v12  ;;  %vm722_vm14 = vcmp.eq.s32.totalorder %v2459_v6, %v705_v12  ;;  %vm610_vm15 = vmor %vm466_vm11, %vm578_vm10  ;;  %v2561_v12 = vrot.slane %v2423_v3, %v157_v8 }
  0xcf   :  { %v360_v10 = vpop.permute.xlu1 %359  ;;  %v788_v11 = vpop.permute.xlu0 %787  ;;  %vm753_vm1 = vmor %vm609_vm13, %vm721_vm12 }
  0xd0   :  { %v849_v13 = vadd.s32 160, %v788_v11  ;;  %vm754_vm3 = vmor %vm610_vm15, %vm722_vm14  ;;  %v418_v23 = vadd.s32 64, %v360_v10 }
  0xd1   :  { %138 = vbcast.lane.b32.xlu1 %v2452_v62, 256  ;;  %959 = vbcast.lane.b32.xlu0 %v125_v58, 270 }
  0xd2   :  { %vm866_vm0 = vcmp.eq.s32.totalorder %v2459_v6, %v849_v13  ;;  %vm865_vm2 = vcmp.eq.s32.totalorder %v2455_v63, %v849_v13 }
  0xd3   :  { %v99_v14 = vpop.permute.xlu1 %98  ;;  %v932_v15 = vpop.permute.xlu0 %931  ;;  %vm898_vm6 = vmor %vm754_vm3, %vm866_vm0  ;;  %vm291_vm0 = vcmp.eq.s32.totalorder %v2455_v63, %v274_v20 }
  0xd4   :  { %v993_v16 = vadd.s32 192, %v932_v15  ;;  %vm897_vm8 = vmor %vm753_vm1, %vm865_vm2  ;;  %vm179_vm12 = vcmp.eq.s32.totalorder %v2455_v63, %v99_v14  ;;  %vm180_vm14 = vcmp.eq.s32.totalorder %v2459_v6, %v99_v14  ;;  %vm292_vm1 = vcmp.eq.s32.totalorder %v2459_v6, %v274_v20 }
  0xd5   :  { %1103 = vbcast.lane.b32.xlu1 %v125_v58, 271  ;;  %531 = vbcast.lane.b32.xlu0 %v2452_v62, 259  ;;  %vm323_vm2 = vmor %vm179_vm12, %vm291_vm0 }
  0xd6   :  { %vm1010_vm4 = vcmp.eq.s32.totalorder %v2459_v6, %v993_v16  ;;  %vm1009_vm5 = vcmp.eq.s32.totalorder %v2455_v63, %v993_v16  ;;  %vm324_vm3 = vmor %vm180_vm14, %vm292_vm1 }
  0xd7   :  { %v1076_v17 = vpop.permute.xlu1 %1075  ;;  %v504_v18 = vpop.permute.xlu0 %503  ;;  %vm1042_vm9 = vmor %vm898_vm6, %vm1010_vm4  ;;  %vm435_vm4 = vcmp.eq.s32.totalorder %v2455_v63, %v418_v23  ;;  %vm436_vm6 = vcmp.eq.s32.totalorder %v2459_v6, %v418_v23 }
  0xd8   :  { %v1137_v19 = vadd.s32 224, %v1076_v17  ;;  %vm1041_vm11 = vmor %vm897_vm8, %vm1009_vm5  ;;  %v562_v24 = vadd.s32 96, %v504_v18 }
  0xd9   :  { %247 = vbcast.lane.b32.xlu1 %v2452_v62, 265  ;;  %675 = vbcast.lane.b32.xlu0 %v2452_v62, 260 }
  0xda   :  { %vm1154_vm7 = vcmp.eq.s32.totalorder %v2459_v6, %v1137_v19  ;;  %vm1153_vm10 = vcmp.eq.s32.totalorder %v2455_v63, %v1137_v19  ;;  %vm579_vm5 = vcmp.eq.s32.totalorder %v2455_v63, %v562_v24  ;;  %vm580_vm8 = vcmp.eq.s32.totalorder %v2459_v6, %v562_v24 }
  0xdb   :  { %v220_v21 = vpop.permute.xlu1 %219  ;;  %v648_v22 = vpop.permute.xlu0 %647  ;;  %vm1186_vm13 = vmor %vm1042_vm9, %vm1154_vm7 }
  0xdc   :  { %vm1185_vm15 = vmor %vm1041_vm11, %vm1153_vm10  ;;  %v1886_v26 = vsel %vm1186_vm13, 1.0, %v2318_v25  ;;  %v706_v30 = vadd.s32 128, %v648_v22  ;;  %v275_v40 = vadd.s32 32, %v220_v21 }
  0xdd   :  { %391 = vbcast.lane.b32.xlu1 %v2452_v62, 266  ;;  %819 = vbcast.lane.b32.xlu0 %v2452_v62, 261  ;;  %v1885_v27 = vsel %vm1185_vm15, 1.0, %v2318_v25  ;;  %vm467_vm7 = vmor %vm323_vm2, %vm435_vm4 }
  0xde   :  { %1384 = vmatprep.mubr.f32.mxu0 %v1886_v26  ;;  %vm468_vm9 = vmor %vm324_vm3, %vm436_vm6  ;;  %vm723_vm10 = vcmp.eq.s32.totalorder %v2455_v63, %v706_v30  ;;  %vm724_vm12 = vcmp.eq.s32.totalorder %v2459_v6, %v706_v30 }
  0xdf   :  { %v364_v28 = vpop.permute.xlu1 %363  ;;  %v792_v29 = vpop.permute.xlu0 %791  ;;  %1385 = vmatmul.mubr.f32.vlgmr.msra.gmra.mrb[0].mxu0 %v1885_v27  ;;  %vm611_vm11 = vmor %vm467_vm7, %vm579_vm5 }
  0xe0   :  { %v850_v32 = vadd.s32 160, %v792_v29  ;;  %vm612_vm13 = vmor %vm468_vm9, %vm580_vm8  ;;  %v419_v43 = vadd.s32 64, %v364_v28 }
  0xe1   :  { %142 = vbcast.lane.b32.xlu1 %v2452_v62, 264  ;;  %963 = vbcast.lane.b32.xlu0 %v2452_v62, 262  ;;  %vm755_vm15 = vmor %vm611_vm11, %vm723_vm10 }
  0xe2   :  { %vm868_vm14 = vcmp.eq.s32.totalorder %v2459_v6, %v850_v32  ;;  %vm867_vm0 = vcmp.eq.s32.totalorder %v2455_v63, %v850_v32  ;;  %vm756_vm1 = vmor %vm612_vm13, %vm724_vm12 }
  0xe3   :  { %v106_v33 = vpop.permute.xlu1 %105  ;;  %v936_v34 = vpop.permute.xlu0 %935  ;;  %vm900_vm4 = vmor %vm756_vm1, %vm868_vm14  ;;  %vm293_vm14 = vcmp.eq.s32.totalorder %v2455_v63, %v275_v40 }
  0xe4   :  { %v994_v35 = vadd.s32 192, %v936_v34  ;;  %vm899_vm6 = vmor %vm755_vm15, %vm867_vm0  ;;  %vm181_vm10 = vcmp.eq.s32.totalorder %v2455_v63, %v106_v33  ;;  %vm182_vm12 = vcmp.eq.s32.totalorder %v2459_v6, %v106_v33  ;;  %vm294_vm15 = vcmp.eq.s32.totalorder %v2459_v6, %v275_v40 }
  0xe5   :  { %1107 = vbcast.lane.b32.xlu1 %v2452_v62, 263  ;;  %535 = vbcast.lane.b32.xlu0 %v2452_v62, 267  ;;  %vm325_vm0 = vmor %vm181_vm10, %vm293_vm14 }
  0xe6   :  { %vm1012_vm2 = vcmp.eq.s32.totalorder %v2459_v6, %v994_v35  ;;  %vm1011_vm3 = vcmp.eq.s32.totalorder %v2455_v63, %v994_v35  ;;  %vm326_vm1 = vmor %vm182_vm12, %vm294_vm15 }
  0xe7   :  { %v1080_v37 = vpop.permute.xlu1 %1079  ;;  %v508_v38 = vpop.permute.xlu0 %507  ;;  %vm1044_vm7 = vmor %vm900_vm4, %vm1012_vm2  ;;  %vm437_vm2 = vcmp.eq.s32.totalorder %v2455_v63, %v419_v43  ;;  %vm438_vm4 = vcmp.eq.s32.totalorder %v2459_v6, %v419_v43 }
  0xe8   :  { %v1138_v39 = vadd.s32 224, %v1080_v37  ;;  %vm1043_vm9 = vmor %vm899_vm6, %vm1011_vm3  ;;  %v563_v44 = vadd.s32 96, %v508_v38 }
  0xe9   :  { %251 = vbcast.lane.b32.xlu1 %v2503_v36, 257  ;;  %679 = vbcast.lane.b32.xlu0 %v2452_v62, 268 }
  0xea   :  { %vm1156_vm5 = vcmp.eq.s32.totalorder %v2459_v6, %v1138_v39  ;;  %vm1155_vm8 = vcmp.eq.s32.totalorder %v2455_v63, %v1138_v39  ;;  %vm581_vm3 = vcmp.eq.s32.totalorder %v2455_v63, %v563_v44  ;;  %vm582_vm6 = vcmp.eq.s32.totalorder %v2459_v6, %v563_v44 }
  0xeb   :  { %v224_v41 = vpop.permute.xlu1 %223  ;;  %v652_v42 = vpop.permute.xlu0 %651  ;;  %vm1188_vm11 = vmor %vm1044_vm7, %vm1156_vm5  ;;  %v168_v44 = vsub.s32 7, %v2420_v1 }
  0xec   :  { %vm1187_vm13 = vmor %vm1043_vm9, %vm1155_vm8  ;;  %v1888_v45 = vsel %vm1188_vm11, 1.0, %v2318_v25  ;;  %v707_v49 = vadd.s32 128, %v652_v42  ;;  %v276_v57 = vadd.s32 32, %v224_v41 }
  0xed   :  { %395 = vbcast.lane.b32.xlu1 %v2503_v36, 258  ;;  %823 = vbcast.lane.b32.xlu0 %v2452_v62, 269  ;;  %v1887_v46 = vsel %vm1187_vm13, 1.0, %v2318_v25  ;;  %vm469_vm5 = vmor %vm325_vm0, %vm437_vm2 }
  0xee   :  { %1389 = vmatprep.mubr.f32.mxu0 %v1888_v45  ;;  %vm470_vm7 = vmor %vm326_vm1, %vm438_vm4  ;;  %vm725_vm8 = vcmp.eq.s32.totalorder %v2455_v63, %v707_v49  ;;  %vm726_vm10 = vcmp.eq.s32.totalorder %v2459_v6, %v707_v49  ;;  %v2617_v49 = vrot.slane %v2423_v3, %v168_v44 }
  0xef   :  { %v368_v47 = vpop.permute.xlu1 %367  ;;  %v796_v48 = vpop.permute.xlu0 %795  ;;  %1390 = vmatmul.mubr.f32.gmra.mrb[2].mxu0 %v1887_v46  ;;  %vm613_vm9 = vmor %vm469_vm5, %vm581_vm3 }
  0xf0   :  { %v851_v50 = vadd.s32 160, %v796_v48  ;;  %vm614_vm11 = vmor %vm470_vm7, %vm582_vm6  ;;  %v420_v60 = vadd.s32 64, %v368_v47 }
  0xf1   :  { %149 = vbcast.lane.b32.xlu1 %v2503_v36, 256  ;;  %967 = vbcast.lane.b32.xlu0 %v2452_v62, 270  ;;  %vm757_vm13 = vmor %vm613_vm9, %vm725_vm8 }
  0xf2   :  { %vm870_vm12 = vcmp.eq.s32.totalorder %v2459_v6, %v851_v50  ;;  %vm869_vm14 = vcmp.eq.s32.totalorder %v2455_v63, %v851_v50  ;;  %vm758_vm15 = vmor %vm614_vm11, %vm726_vm10 }
  0xf3   :  { %v110_v51 = vpop.permute.xlu1 %109  ;;  %v940_v52 = vpop.permute.xlu0 %939  ;;  %vm902_vm2 = vmor %vm758_vm15, %vm870_vm12  ;;  %vm295_vm12 = vcmp.eq.s32.totalorder %v2455_v63, %v276_v57 }
  0xf4   :  { %v995_v53 = vadd.s32 192, %v940_v52  ;;  %vm901_vm4 = vmor %vm757_vm13, %vm869_vm14  ;;  %vm183_vm8 = vcmp.eq.s32.totalorder %v2455_v63, %v110_v51  ;;  %vm184_vm10 = vcmp.eq.s32.totalorder %v2459_v6, %v110_v51  ;;  %vm296_vm13 = vcmp.eq.s32.totalorder %v2459_v6, %v276_v57 }
  0xf5   :  { %1111 = vbcast.lane.b32.xlu1 %v2452_v62, 271  ;;  %539 = vbcast.lane.b32.xlu0 %v2503_v36, 259  ;;  %vm327_vm14 = vmor %vm183_vm8, %vm295_vm12 }
  0xf6   :  { %vm1014_vm0 = vcmp.eq.s32.totalorder %v2459_v6, %v995_v53  ;;  %vm1013_vm1 = vcmp.eq.s32.totalorder %v2455_v63, %v995_v53  ;;  %vm328_vm15 = vmor %vm184_vm10, %vm296_vm13 }
  0xf7   :  { %v1084_v54 = vpop.permute.xlu1 %1083  ;;  %v512_v55 = vpop.permute.xlu0 %511  ;;  %vm1046_vm5 = vmor %vm902_vm2, %vm1014_vm0  ;;  %vm439_vm0 = vcmp.eq.s32.totalorder %v2455_v63, %v420_v60  ;;  %vm440_vm2 = vcmp.eq.s32.totalorder %v2459_v6, %v420_v60 }
  0xf8   :  { %v1139_v56 = vadd.s32 224, %v1084_v54  ;;  %vm1045_vm7 = vmor %vm901_vm4, %vm1013_vm1  ;;  %v564_v61 = vadd.s32 96, %v512_v55 }
  0xf9   :  { %255 = vbcast.lane.b32.xlu1 %v2503_v36, 265  ;;  %683 = vbcast.lane.b32.xlu0 %v2503_v36, 260 }
  0xfa   :  { %vm1158_vm3 = vcmp.eq.s32.totalorder %v2459_v6, %v1139_v56  ;;  %vm1157_vm6 = vcmp.eq.s32.totalorder %v2455_v63, %v1139_v56  ;;  %vm583_vm1 = vcmp.eq.s32.totalorder %v2455_v63, %v564_v61  ;;  %vm584_vm4 = vcmp.eq.s32.totalorder %v2459_v6, %v564_v61 }
  0xfb   :  { %v228_v58 = vpop.permute.xlu1 %227  ;;  %v656_v59 = vpop.permute.xlu0 %655  ;;  %vm1190_vm9 = vmor %vm1046_vm5, %vm1158_vm3 }
  0xfc   :  { %v1890_v62 = vsel %vm1190_vm9, 1.0, %v2318_v25  ;;  %vm1189_vm11 = vmor %vm1045_vm7, %vm1157_vm6  ;;  %v708_v7 = vadd.s32 128, %v656_v59  ;;  %v277_v16 = vadd.s32 32, %v228_v58 }
  0xfd   :  { %399 = vbcast.lane.b32.xlu1 %v2503_v36, 266  ;;  %827 = vbcast.lane.b32.xlu0 %v2503_v36, 261  ;;  %v1889_v2 = vsel %vm1189_vm11, 1.0, %v2318_v25  ;;  %vm471_vm3 = vmor %vm327_vm14, %vm439_vm0 }
  0xfe   :  { %1394 = vmatprep.mubr.f32.mxu0 %v1890_v62  ;;  %vm472_vm5 = vmor %vm328_vm15, %vm440_vm2  ;;  %vm727_vm6 = vcmp.eq.s32.totalorder %v2455_v63, %v708_v7  ;;  %vm728_vm8 = vcmp.eq.s32.totalorder %v2459_v6, %v708_v7 }
  0xff   :  { %v372_v4 = vpop.permute.xlu1 %371  ;;  %v800_v5 = vpop.permute.xlu0 %799  ;;  %1395 = vmatmul.mubr.f32.gmra.mrb[4].mxu0 %v1889_v2  ;;  %vm615_vm7 = vmor %vm471_vm3, %vm583_vm1 }
 0x100   :  { %v852_v9 = vadd.s32 160, %v800_v5  ;;  %vm616_vm9 = vmor %vm472_vm5, %vm584_vm4  ;;  %v421_v19 = vadd.s32 64, %v372_v4 }
 0x101   :  { %153 = vbcast.lane.b32.xlu1 %v2503_v36, 264  ;;  %971 = vbcast.lane.b32.xlu0 %v2503_v36, 262  ;;  %vm759_vm11 = vmor %vm615_vm7, %vm727_vm6 }
 0x102   :  { %vm871_vm10 = vcmp.eq.s32.totalorder %v2455_v63, %v852_v9  ;;  %vm872_vm12 = vcmp.eq.s32.totalorder %v2459_v6, %v852_v9  ;;  %vm760_vm13 = vmor %vm616_vm9, %vm728_vm8 }
 0x103   :  { %v117_v0 = vpop.permute.xlu1 %116  ;;  %v944_v10 = vpop.permute.xlu0 %943  ;;  %vm903_vm15 = vmor %vm759_vm11, %vm871_vm10  ;;  %vm297_vm10 = vcmp.eq.s32.totalorder %v2455_v63, %v277_v16  ;;  %vm298_vm11 = vcmp.eq.s32.totalorder %v2459_v6, %v277_v16 }
 0x104   :  { %v996_v11 = vadd.s32 192, %v944_v10  ;;  %vm904_vm1 = vmor %vm760_vm13, %vm872_vm12  ;;  %vm185_vm6 = vcmp.eq.s32.totalorder %v2455_v63, %v117_v0  ;;  %vm186_vm8 = vcmp.eq.s32.totalorder %v2459_v6, %v117_v0 }
 0x105   :  { %1115 = vbcast.lane.b32.xlu1 %v2503_v36, 263  ;;  %543 = vbcast.lane.b32.xlu0 %v2503_v36, 267  ;;  %vm329_vm12 = vmor %vm185_vm6, %vm297_vm10 }
 0x106   :  { %vm1015_vm14 = vcmp.eq.s32.totalorder %v2455_v63, %v996_v11  ;;  %vm1016_vm0 = vcmp.eq.s32.totalorder %v2459_v6, %v996_v11  ;;  %vm330_vm13 = vmor %vm186_vm8, %vm298_vm11 }
 0x107   :  { %v1088_v13 = vpop.permute.xlu1 %1087  ;;  %v516_v14 = vpop.permute.xlu0 %515  ;;  %vm1047_vm3 = vmor %vm903_vm15, %vm1015_vm14  ;;  %vm441_vm14 = vcmp.eq.s32.totalorder %v2455_v63, %v421_v19 }
 0x108   :  { %v1140_v15 = vadd.s32 224, %v1088_v13  ;;  %vm1048_vm5 = vmor %vm904_vm1, %vm1016_vm0  ;;  %v565_v20 = vadd.s32 96, %v516_v14  ;;  %vm442_vm0 = vcmp.eq.s32.totalorder %v2459_v6, %v421_v19 }
 0x109   :  { %259 = vbcast.lane.b32.xlu1 %v2561_v12, 257  ;;  %687 = vbcast.lane.b32.xlu0 %v2503_v36, 268  ;;  %vm473_vm1 = vmor %vm329_vm12, %vm441_vm14 }
 0x10a   :  { %vm1160_vm2 = vcmp.eq.s32.totalorder %v2459_v6, %v1140_v15  ;;  %vm1159_vm4 = vcmp.eq.s32.totalorder %v2455_v63, %v1140_v15  ;;  %vm585_vm15 = vcmp.eq.s32.totalorder %v2455_v63, %v565_v20 }
 0x10b   :  { %v232_v17 = vpop.permute.xlu1 %231  ;;  %v660_v18 = vpop.permute.xlu0 %659  ;;  %vm1192_vm7 = vmor %vm1048_vm5, %vm1160_vm2  ;;  %vm586_vm2 = vcmp.eq.s32.totalorder %v2459_v6, %v565_v20 }
 0x10c   :  { %vm1191_vm9 = vmor %vm1047_vm3, %vm1159_vm4  ;;  %v1892_v21 = vsel %vm1192_vm7, 1.0, %v2318_v25  ;;  %v709_v26 = vadd.s32 128, %v660_v18  ;;  %v278_v34 = vadd.s32 32, %v232_v17 }
 0x10d   :  { %403 = vbcast.lane.b32.xlu1 %v2561_v12, 258  ;;  %831 = vbcast.lane.b32.xlu0 %v2503_v36, 269  ;;  %v1891_v22 = vsel %vm1191_vm9, 1.0, %v2318_v25  ;;  %vm474_vm3 = vmor %vm330_vm13, %vm442_vm0 }
 0x10e   :  { %1399 = vmatprep.mubr.f32.mxu0 %v1892_v21  ;;  %vm729_vm4 = vcmp.eq.s32.totalorder %v2455_v63, %v709_v26  ;;  %vm617_vm5 = vmor %vm473_vm1, %vm585_vm15  ;;  %vm730_vm6 = vcmp.eq.s32.totalorder %v2459_v6, %v709_v26 }
 0x10f   :  { %v376_v23 = vpop.permute.xlu1 %375  ;;  %v804_v24 = vpop.permute.xlu0 %803  ;;  %1400 = vmatmul.mubr.f32.gmra.mrb[6].mxu0 %v1891_v22  ;;  %vm618_vm7 = vmor %vm474_vm3, %vm586_vm2 }
 0x110   :  { %v853_v27 = vadd.s32 160, %v804_v24  ;;  %vm761_vm9 = vmor %vm617_vm5, %vm729_vm4  ;;  %v422_v37 = vadd.s32 64, %v376_v23 }
 0x111   :  { %160 = vbcast.lane.b32.xlu1 %v2561_v12, 256  ;;  %975 = vbcast.lane.b32.xlu0 %v2503_v36, 270  ;;  %vm762_vm11 = vmor %vm618_vm7, %vm730_vm6 }
 0x112   :  { %vm873_vm8 = vcmp.eq.s32.totalorder %v2455_v63, %v853_v27  ;;  %vm874_vm10 = vcmp.eq.s32.totalorder %v2459_v6, %v853_v27 }
 0x113   :  { %v121_v28 = vpop.permute.xlu1 %120  ;;  %v948_v29 = vpop.permute.xlu0 %947  ;;  %vm905_vm13 = vmor %vm761_vm9, %vm873_vm8  ;;  %vm299_vm8 = vcmp.eq.s32.totalorder %v2455_v63, %v278_v34  ;;  %vm300_vm9 = vcmp.eq.s32.totalorder %v2459_v6, %v278_v34 }
 0x114   :  { %v997_v30 = vadd.s32 192, %v948_v29  ;;  %vm906_vm15 = vmor %vm762_vm11, %vm874_vm10  ;;  %vm187_vm4 = vcmp.eq.s32.totalorder %v2455_v63, %v121_v28  ;;  %vm188_vm6 = vcmp.eq.s32.totalorder %v2459_v6, %v121_v28 }
 0x115   :  { %1119 = vbcast.lane.b32.xlu1 %v2503_v36, 271  ;;  %547 = vbcast.lane.b32.xlu0 %v2561_v12, 259  ;;  %vm331_vm10 = vmor %vm187_vm4, %vm299_vm8 }
 0x116   :  { %vm1017_vm12 = vcmp.eq.s32.totalorder %v2455_v63, %v997_v30  ;;  %vm1018_vm14 = vcmp.eq.s32.totalorder %v2459_v6, %v997_v30  ;;  %vm332_vm11 = vmor %vm188_vm6, %vm300_vm9 }
 0x117   :  { %v1092_v31 = vpop.permute.xlu1 %1091  ;;  %v520_v32 = vpop.permute.xlu0 %519  ;;  %vm1049_vm1 = vmor %vm905_vm13, %vm1017_vm12  ;;  %vm443_vm12 = vcmp.eq.s32.totalorder %v2455_v63, %v422_v37 }
 0x118   :  { %v1141_v33 = vadd.s32 224, %v1092_v31  ;;  %vm1050_vm3 = vmor %vm906_vm15, %vm1018_vm14  ;;  %v566_v38 = vadd.s32 96, %v520_v32  ;;  %vm444_vm14 = vcmp.eq.s32.totalorder %v2459_v6, %v422_v37 }
 0x119   :  { %263 = vbcast.lane.b32.xlu1 %v2561_v12, 265  ;;  %691 = vbcast.lane.b32.xlu0 %v2561_v12, 260  ;;  %vm475_vm15 = vmor %vm331_vm10, %vm443_vm12 }
 0x11a   :  { %vm1162_vm0 = vcmp.eq.s32.totalorder %v2459_v6, %v1141_v33  ;;  %vm1161_vm2 = vcmp.eq.s32.totalorder %v2455_v63, %v1141_v33  ;;  %vm587_vm13 = vcmp.eq.s32.totalorder %v2455_v63, %v566_v38 }
 0x11b   :  { %v236_v35 = vpop.permute.xlu1 %235  ;;  %v664_v36 = vpop.permute.xlu0 %663  ;;  %vm1194_vm5 = vmor %vm1050_vm3, %vm1162_vm0  ;;  %vm588_vm0 = vcmp.eq.s32.totalorder %v2459_v6, %v566_v38 }
 0x11c   :  { %vm1193_vm7 = vmor %vm1049_vm1, %vm1161_vm2  ;;  %v1894_v39 = vsel %vm1194_vm5, 1.0, %v2318_v25  ;;  %v710_v43 = vadd.s32 128, %v664_v36  ;;  %v279_v3 = vadd.s32 32, %v236_v35 }
 0x11d   :  { %407 = vbcast.lane.b32.xlu1 %v2561_v12, 266  ;;  %835 = vbcast.lane.b32.xlu0 %v2561_v12, 261  ;;  %v1893_v40 = vsel %vm1193_vm7, 1.0, %v2318_v25  ;;  %vm476_vm1 = vmor %vm332_vm11, %vm444_vm14 }
 0x11e   :  { %1404 = vmatprep.mubr.f32.mxu0 %v1894_v39  ;;  %vm731_vm2 = vcmp.eq.s32.totalorder %v2455_v63, %v710_v43  ;;  %vm619_vm3 = vmor %vm475_vm15, %vm587_vm13  ;;  %vm732_vm4 = vcmp.eq.s32.totalorder %v2459_v6, %v710_v43 }
 0x11f   :  { %v380_v41 = vpop.permute.xlu1 %379  ;;  %v808_v42 = vpop.permute.xlu0 %807  ;;  %1405 = vmatmul.mubr.f32.gmra.mrb[8].mxu0 %v1893_v40  ;;  %vm620_vm5 = vmor %vm476_vm1, %vm588_vm0 }
 0x120   :  { %v854_v45 = vadd.s32 160, %v808_v42  ;;  %vm763_vm7 = vmor %vm619_vm3, %vm731_vm2  ;;  %v423_v55 = vadd.s32 64, %v380_v41 }
 0x121   :  { %164 = vbcast.lane.b32.xlu1 %v2561_v12, 264  ;;  %979 = vbcast.lane.b32.xlu0 %v2561_v12, 262  ;;  %vm764_vm9 = vmor %vm620_vm5, %vm732_vm4 }
 0x122   :  { %vm875_vm6 = vcmp.eq.s32.totalorder %v2455_v63, %v854_v45  ;;  %vm876_vm8 = vcmp.eq.s32.totalorder %v2459_v6, %v854_v45 }
 0x123   :  { %v128_v46 = vpop.permute.xlu1 %127  ;;  %v952_v47 = vpop.permute.xlu0 %951  ;;  %vm907_vm11 = vmor %vm763_vm7, %vm875_vm6  ;;  %vm301_vm6 = vcmp.eq.s32.totalorder %v2455_v63, %v279_v3  ;;  %vm302_vm7 = vcmp.eq.s32.totalorder %v2459_v6, %v279_v3 }
 0x124   :  { %v998_v48 = vadd.s32 192, %v952_v47  ;;  %vm908_vm13 = vmor %vm764_vm9, %vm876_vm8  ;;  %vm189_vm2 = vcmp.eq.s32.totalorder %v2455_v63, %v128_v46  ;;  %vm190_vm4 = vcmp.eq.s32.totalorder %v2459_v6, %v128_v46 }
 0x125   :  { %1123 = vbcast.lane.b32.xlu1 %v2561_v12, 263  ;;  %551 = vbcast.lane.b32.xlu0 %v2561_v12, 267  ;;  %vm333_vm8 = vmor %vm189_vm2, %vm301_vm6 }
 0x126   :  { %vm1019_vm10 = vcmp.eq.s32.totalorder %v2455_v63, %v998_v48  ;;  %vm1020_vm12 = vcmp.eq.s32.totalorder %v2459_v6, %v998_v48  ;;  %vm334_vm9 = vmor %vm190_vm4, %vm302_vm7 }
 0x127   :  { %v1096_v50 = vpop.permute.xlu1 %1095  ;;  %v524_v51 = vpop.permute.xlu0 %523  ;;  %vm1051_vm15 = vmor %vm907_vm11, %vm1019_vm10  ;;  %vm445_vm10 = vcmp.eq.s32.totalorder %v2455_v63, %v423_v55 }
 0x128   :  { %v1142_v52 = vadd.s32 224, %v1096_v50  ;;  %vm1052_vm1 = vmor %vm908_vm13, %vm1020_vm12  ;;  %v567_v56 = vadd.s32 96, %v524_v51  ;;  %vm446_vm12 = vcmp.eq.s32.totalorder %v2459_v6, %v423_v55 }
 0x129   :  { %267 = vbcast.lane.b32.xlu1 %v2617_v49, 257  ;;  %695 = vbcast.lane.b32.xlu0 %v2561_v12, 268  ;;  %vm477_vm13 = vmor %vm333_vm8, %vm445_vm10 }
 0x12a   :  { %vm1164_vm14 = vcmp.eq.s32.totalorder %v2459_v6, %v1142_v52  ;;  %vm1163_vm0 = vcmp.eq.s32.totalorder %v2455_v63, %v1142_v52  ;;  %vm589_vm11 = vcmp.eq.s32.totalorder %v2455_v63, %v567_v56 }
 0x12b   :  { %v240_v53 = vpop.permute.xlu1 %239  ;;  %v668_v54 = vpop.permute.xlu0 %667  ;;  %vm1196_vm3 = vmor %vm1052_vm1, %vm1164_vm14  ;;  %vm590_vm14 = vcmp.eq.s32.totalorder %v2459_v6, %v567_v56 }
 0x12c   :  { %vm1195_vm5 = vmor %vm1051_vm15, %vm1163_vm0  ;;  %v1896_v57 = vsel %vm1196_vm3, 1.0, %v2318_v25  ;;  %v711_v61 = vadd.s32 128, %v668_v54  ;;  %v280_v0 = vadd.s32 32, %v240_v53 }
 0x12d   :  { %411 = vbcast.lane.b32.xlu1 %v2617_v49, 258  ;;  %839 = vbcast.lane.b32.xlu0 %v2561_v12, 269  ;;  %v1895_v58 = vsel %vm1195_vm5, 1.0, %v2318_v25  ;;  %vm478_vm15 = vmor %vm334_vm9, %vm446_vm12 }
 0x12e   :  { %1409 = vmatprep.mubr.f32.mxu0 %v1896_v57  ;;  %vm733_vm0 = vcmp.eq.s32.totalorder %v2455_v63, %v711_v61  ;;  %vm621_vm1 = vmor %vm477_vm13, %vm589_vm11  ;;  %vm734_vm2 = vcmp.eq.s32.totalorder %v2459_v6, %v711_v61 }
 0x12f   :  { %v384_v59 = vpop.permute.xlu1 %383  ;;  %v812_v60 = vpop.permute.xlu0 %811  ;;  %1410 = vmatmul.mubr.f32.gmra.mrb[10].mxu0 %v1895_v58  ;;  %vm622_vm3 = vmor %vm478_vm15, %vm590_vm14 }
 0x130   :  { %v855_v62 = vadd.s32 160, %v812_v60  ;;  %vm765_vm5 = vmor %vm621_vm1, %vm733_vm0 }
 0x131   :  { %171 = vbcast.lane.b32.xlu1 %v2617_v49, 256  ;;  %983 = vbcast.lane.b32.xlu0 %v2561_v12, 270  ;;  %vm766_vm7 = vmor %vm622_vm3, %vm734_vm2 }
 0x132   :  { %vm877_vm4 = vcmp.eq.s32.totalorder %v2455_v63, %v855_v62  ;;  %vm878_vm6 = vcmp.eq.s32.totalorder %v2459_v6, %v855_v62 }
 0x133   :  { %v132_v2 = vpop.permute.xlu1 %131  ;;  %v956_v4 = vpop.permute.xlu0 %955  ;;  %vm909_vm9 = vmor %vm765_vm5, %vm877_vm4  ;;  %vm303_vm4 = vcmp.eq.s32.totalorder %v2455_v63, %v280_v0  ;;  %vm304_vm5 = vcmp.eq.s32.totalorder %v2459_v6, %v280_v0 }
 0x134   :  { %v999_v5 = vadd.s32 192, %v956_v4  ;;  %vm910_vm11 = vmor %vm766_vm7, %vm878_vm6  ;;  %vm191_vm0 = vcmp.eq.s32.totalorder %v2455_v63, %v132_v2  ;;  %vm192_vm2 = vcmp.eq.s32.totalorder %v2459_v6, %v132_v2 }
 0x135   :  { %1127 = vbcast.lane.b32.xlu1 %v2561_v12, 271  ;;  %555 = vbcast.lane.b32.xlu0 %v2617_v49, 259  ;;  %v424_v12 = vadd.s32 64, %v384_v59  ;;  %vm335_vm6 = vmor %vm191_vm0, %vm303_vm4 }
 0x136   :  { %vm1021_vm8 = vcmp.eq.s32.totalorder %v2455_v63, %v999_v5  ;;  %vm1022_vm10 = vcmp.eq.s32.totalorder %v2459_v6, %v999_v5  ;;  %vm336_vm7 = vmor %vm192_vm2, %vm304_vm5 }
 0x137   :  { %v1100_v7 = vpop.permute.xlu1 %1099  ;;  %v528_v8 = vpop.permute.xlu0 %527  ;;  %vm1053_vm13 = vmor %vm909_vm9, %vm1021_vm8  ;;  %vm447_vm8 = vcmp.eq.s32.totalorder %v2455_v63, %v424_v12 }
 0x138   :  { %v1143_v9 = vadd.s32 224, %v1100_v7  ;;  %vm1054_vm15 = vmor %vm910_vm11, %vm1022_vm10  ;;  %v568_v13 = vadd.s32 96, %v528_v8  ;;  %vm448_vm10 = vcmp.eq.s32.totalorder %v2459_v6, %v424_v12 }
 0x139   :  { %271 = vbcast.lane.b32.xlu1 %v2617_v49, 265  ;;  %699 = vbcast.lane.b32.xlu0 %v2617_v49, 260  ;;  %vm479_vm11 = vmor %vm335_vm6, %vm447_vm8 }
 0x13a   :  { %vm1166_vm12 = vcmp.eq.s32.totalorder %v2459_v6, %v1143_v9  ;;  %vm1165_vm14 = vcmp.eq.s32.totalorder %v2455_v63, %v1143_v9  ;;  %vm591_vm9 = vcmp.eq.s32.totalorder %v2455_v63, %v568_v13 }
 0x13b   :  { %v244_v10 = vpop.permute.xlu1 %243  ;;  %v672_v11 = vpop.permute.xlu0 %671  ;;  %vm1198_vm1 = vmor %vm1054_vm15, %vm1166_vm12  ;;  %vm592_vm12 = vcmp.eq.s32.totalorder %v2459_v6, %v568_v13 }
 0x13c   :  { %vm1197_vm3 = vmor %vm1053_vm13, %vm1165_vm14  ;;  %v1898_v14 = vsel %vm1198_vm1, 1.0, %v2318_v25  ;;  %v712_v18 = vadd.s32 128, %v672_v11  ;;  %v281_v27 = vadd.s32 32, %v244_v10 }
 0x13d   :  { %415 = vbcast.lane.b32.xlu1 %v2617_v49, 266  ;;  %843 = vbcast.lane.b32.xlu0 %v2617_v49, 261  ;;  %v1897_v15 = vsel %vm1197_vm3, 1.0, %v2318_v25  ;;  %vm480_vm13 = vmor %vm336_vm7, %vm448_vm10 }
 0x13e   :  { %1414 = vmatprep.mubr.f32.mxu0 %v1898_v14  ;;  %vm735_vm14 = vcmp.eq.s32.totalorder %v2455_v63, %v712_v18  ;;  %vm623_vm15 = vmor %vm479_vm11, %vm591_vm9  ;;  %vm736_vm0 = vcmp.eq.s32.totalorder %v2459_v6, %v712_v18 }
 0x13f   :  { %v388_v16 = vpop.permute.xlu1 %387  ;;  %v816_v17 = vpop.permute.xlu0 %815  ;;  %1415 = vmatmul.mubr.f32.gmra.mrb[12].mxu0 %v1897_v15  ;;  %vm624_vm1 = vmor %vm480_vm13, %vm592_vm12 }
 0x140   :  { %v856_v19 = vadd.s32 160, %v816_v17  ;;  %vm767_vm3 = vmor %vm623_vm15, %vm735_vm14  ;;  %v425_v30 = vadd.s32 64, %v388_v16 }
 0x141   :  { %175 = vbcast.lane.b32.xlu1 %v2617_v49, 264  ;;  %987 = vbcast.lane.b32.xlu0 %v2617_v49, 262  ;;  %vm768_vm5 = vmor %vm624_vm1, %vm736_vm0 }
 0x142   :  { %vm879_vm2 = vcmp.eq.s32.totalorder %v2455_v63, %v856_v19  ;;  %vm880_vm4 = vcmp.eq.s32.totalorder %v2459_v6, %v856_v19 }
 0x143   :  { %v139_v20 = vpop.permute.xlu1 %138  ;;  %v960_v21 = vpop.permute.xlu0 %959  ;;  %vm911_vm7 = vmor %vm767_vm3, %vm879_vm2  ;;  %vm305_vm2 = vcmp.eq.s32.totalorder %v2455_v63, %v281_v27  ;;  %vm306_vm3 = vcmp.eq.s32.totalorder %v2459_v6, %v281_v27 }
 0x144   :  { %v1000_v22 = vadd.s32 192, %v960_v21  ;;  %vm912_vm9 = vmor %vm768_vm5, %vm880_vm4  ;;  %vm193_vm14 = vcmp.eq.s32.totalorder %v2455_v63, %v139_v20  ;;  %vm194_vm0 = vcmp.eq.s32.totalorder %v2459_v6, %v139_v20 }
 0x145   :  { %1131 = vbcast.lane.b32.xlu1 %v2617_v49, 263  ;;  %559 = vbcast.lane.b32.xlu0 %v2617_v49, 267  ;;  %vm337_vm4 = vmor %vm193_vm14, %vm305_vm2 }
 0x146   :  { %vm1023_vm6 = vcmp.eq.s32.totalorder %v2455_v63, %v1000_v22  ;;  %vm1024_vm8 = vcmp.eq.s32.totalorder %v2459_v6, %v1000_v22  ;;  %vm338_vm5 = vmor %vm194_vm0, %vm306_vm3 }
 0x147   :  { %v1104_v23 = vpop.permute.xlu1 %1103  ;;  %v532_v24 = vpop.permute.xlu0 %531  ;;  %vm1055_vm11 = vmor %vm911_vm7, %vm1023_vm6  ;;  %vm449_vm6 = vcmp.eq.s32.totalorder %v2455_v63, %v425_v30 }
 0x148   :  { %v1144_v26 = vadd.s32 224, %v1104_v23  ;;  %vm1056_vm13 = vmor %vm912_vm9, %vm1024_vm8  ;;  %v569_v31 = vadd.s32 96, %v532_v24  ;;  %vm450_vm8 = vcmp.eq.s32.totalorder %v2459_v6, %v425_v30 }
 0x149   :  { %847 = vbcast.lane.b32.xlu1 %v2617_v49, 269  ;;  %703 = vbcast.lane.b32.xlu0 %v2617_v49, 268  ;;  %vm481_vm9 = vmor %vm337_vm4, %vm449_vm6 }
 0x14a   :  { %vm1168_vm10 = vcmp.eq.s32.totalorder %v2459_v6, %v1144_v26  ;;  %vm1167_vm12 = vcmp.eq.s32.totalorder %v2455_v63, %v1144_v26  ;;  %vm593_vm7 = vcmp.eq.s32.totalorder %v2455_v63, %v569_v31 }
 0x14b   :  { %v248_v28 = vpop.permute.xlu1 %247  ;;  %v676_v29 = vpop.permute.xlu0 %675  ;;  %vm1200_vm15 = vmor %vm1056_vm13, %vm1168_vm10  ;;  %vm594_vm10 = vcmp.eq.s32.totalorder %v2459_v6, %v569_v31 }
 0x14c   :  { %vm1199_vm1 = vmor %vm1055_vm11, %vm1167_vm12  ;;  %v1900_v32 = vsel %vm1200_vm15, 1.0, %v2318_v25  ;;  %v713_v36 = vadd.s32 128, %v676_v29  ;;  %v282_v46 = vadd.s32 32, %v248_v28 }
 0x14d   :  { %1135 = vbcast.lane.b32.xlu1 %v2617_v49, 271  ;;  %991 = vbcast.lane.b32.xlu0 %v2617_v49, 270  ;;  %v1899_v33 = vsel %vm1199_vm1, 1.0, %v2318_v25  ;;  %vm482_vm11 = vmor %vm338_vm5, %vm450_vm8 }
 0x14e   :  { %1419 = vmatprep.mubr.f32.mxu0 %v1900_v32  ;;  %vm737_vm12 = vcmp.eq.s32.totalorder %v2455_v63, %v713_v36  ;;  %vm625_vm13 = vmor %vm481_vm9, %vm593_vm7  ;;  %vm738_vm14 = vcmp.eq.s32.totalorder %v2459_v6, %v713_v36 }
 0x14f   :  { %v392_v34 = vpop.permute.xlu1 %391  ;;  %v820_v35 = vpop.permute.xlu0 %819  ;;  %1420 = vmatmul.mubr.f32.gmra.mrb[14].mxu0 %v1899_v33  ;;  %vm626_vm15 = vmor %vm482_vm11, %vm594_vm10 }
 0x150   :  { %v857_v37 = vadd.s32 160, %v820_v35  ;;  %vm2695_vm1 = vmor %vm625_vm13, %vm737_vm12  ;;  %v426_v49 = vadd.s32 64, %v392_v34 }
 0x151   :  { %vm770_vm3 = vmor %vm626_vm15, %vm738_vm14 }
 0x152   :  { %vm882_vm0 = vcmp.eq.s32.totalorder %v2459_v6, %v857_v37  ;;  %vm881_vm4 = vcmp.eq.s32.totalorder %v2455_v63, %v857_v37 }
 0x153   :  { %v143_v38 = vpop.permute.xlu1 %142  ;;  %v964_v39 = vpop.permute.xlu0 %963  ;;  %vm914_vm5 = vmor %vm770_vm3, %vm882_vm0  ;;  %vm307_vm0 = vcmp.eq.s32.totalorder %v2455_v63, %v282_v46 }
 0x154   :  { %v1001_v40 = vadd.s32 192, %v964_v39  ;;  %vm913_vm11 = vmor %vm2695_vm1, %vm881_vm4  ;;  %vm195_vm13 = vcmp.eq.s32.totalorder %v2455_v63, %v143_v38  ;;  %vm196_vm15 = vcmp.eq.s32.totalorder %v2459_v6, %v143_v38  ;;  %vm308_vm1 = vcmp.eq.s32.totalorder %v2459_v6, %v282_v46 }
 0x155   :  { %vm340_vm3 = vmor %vm196_vm15, %vm308_vm1  ;;  %vm451_vm4 = vcmp.eq.s32.totalorder %v2455_v63, %v426_v49 }
 0x156   :  { %vm1026_vm2 = vcmp.eq.s32.totalorder %v2459_v6, %v1001_v40  ;;  %vm1025_vm6 = vcmp.eq.s32.totalorder %v2455_v63, %v1001_v40 }
 0x157   :  { %v1108_v42 = vpop.permute.xlu1 %1107  ;;  %v536_v44 = vpop.permute.xlu0 %535  ;;  %vm1058_vm7 = vmor %vm914_vm5, %vm1026_vm2 }
 0x158   :  { %v1145_v43 = vadd.s32 224, %v1108_v42  ;;  %vm1057_vm12 = vmor %vm913_vm11, %vm1025_vm6  ;;  %v570_v50 = vadd.s32 96, %v536_v44  ;;  %vm452_vm6 = vcmp.eq.s32.totalorder %v2459_v6, %v426_v49 }
 0x159   :  { %vm339_vm2 = vmor %vm195_vm13, %vm307_vm0 }
 0x15a   :  { %vm1170_vm8 = vcmp.eq.s32.totalorder %v2459_v6, %v1145_v43  ;;  %vm1169_vm9 = vcmp.eq.s32.totalorder %v2455_v63, %v1145_v43  ;;  %vm595_vm5 = vcmp.eq.s32.totalorder %v2455_v63, %v570_v50 }
 0x15b   :  { %v252_v45 = vpop.permute.xlu1 %251  ;;  %vm1202_vm10 = vmor %vm1058_vm7, %vm1170_vm8  ;;  %v680_v47 = vpop.permute.xlu0 %679  ;;  %vm596_vm8 = vcmp.eq.s32.totalorder %v2459_v6, %v570_v50 }
 0x15c   :  { %v1902_v48 = vsel %vm1202_vm10, 1.0, %v2318_v25  ;;  %vm1201_vm14 = vmor %vm1057_vm12, %vm1169_vm9  ;;  %v714_v53 = vadd.s32 128, %v680_v47  ;;  %v283_v62 = vadd.s32 32, %v252_v45 }
 0x15d   :  { %1424 = vmatprep.mubr.f32.mxu0 %v1902_v48  ;;  %v1901_v51 = vsel %vm1201_vm14, 1.0, %v2318_v25  ;;  %vm483_vm7 = vmor %vm339_vm2, %vm451_vm4 }
 0x15e   :  { %1425 = vmatmul.mubr.f32.gmra.mrb[16].mxu0 %v1901_v51  ;;  %vm484_vm9 = vmor %vm340_vm3, %vm452_vm6  ;;  %vm739_vm10 = vcmp.eq.s32.totalorder %v2455_v63, %v714_v53  ;;  %vm740_vm12 = vcmp.eq.s32.totalorder %v2459_v6, %v714_v53 }
 0x15f   :  { %v396_v52 = vpop.permute.xlu1 %395  ;;  %v824_v3 = vpop.permute.xlu0 %823  ;;  %vm627_vm11 = vmor %vm483_vm7, %vm595_vm5 }
 0x160   :  { %v858_v54 = vadd.s32 160, %v824_v3  ;;  %vm628_vm13 = vmor %vm484_vm9, %vm596_vm8  ;;  %v427_v4 = vadd.s32 64, %v396_v52 }
 0x161   :  { %vm771_vm15 = vmor %vm627_vm11, %vm739_vm10 }
 0x162   :  { %vm883_vm14 = vcmp.eq.s32.totalorder %v2455_v63, %v858_v54  ;;  %vm884_vm0 = vcmp.eq.s32.totalorder %v2459_v6, %v858_v54  ;;  %vm772_vm1 = vmor %vm628_vm13, %vm740_vm12 }
 0x163   :  { %v150_v55 = vpop.permute.xlu1 %149  ;;  %v968_v56 = vpop.permute.xlu0 %967  ;;  %vm915_vm4 = vmor %vm771_vm15, %vm883_vm14  ;;  %vm309_vm14 = vcmp.eq.s32.totalorder %v2455_v63, %v283_v62  ;;  %vm310_vm15 = vcmp.eq.s32.totalorder %v2459_v6, %v283_v62 }
 0x164   :  { %v1002_v57 = vadd.s32 192, %v968_v56  ;;  %vm916_vm6 = vmor %vm772_vm1, %vm884_vm0  ;;  %vm197_vm10 = vcmp.eq.s32.totalorder %v2455_v63, %v150_v55  ;;  %vm198_vm12 = vcmp.eq.s32.totalorder %v2459_v6, %v150_v55 }
 0x165   :  { %vm341_vm0 = vmor %vm197_vm10, %vm309_vm14 }
 0x166   :  { %vm1027_vm2 = vcmp.eq.s32.totalorder %v2455_v63, %v1002_v57  ;;  %vm1028_vm3 = vcmp.eq.s32.totalorder %v2459_v6, %v1002_v57  ;;  %vm342_vm1 = vmor %vm198_vm12, %vm310_vm15 }
 0x167   :  { %v1112_v58 = vpop.permute.xlu1 %1111  ;;  %v540_v60 = vpop.permute.xlu0 %539  ;;  %vm1059_vm7 = vmor %vm915_vm4, %vm1027_vm2  ;;  %vm453_vm2 = vcmp.eq.s32.totalorder %v2455_v63, %v427_v4 }
 0x168   :  { %v1146_v59 = vadd.s32 224, %v1112_v58  ;;  %vm1060_vm9 = vmor %vm916_vm6, %vm1028_vm3  ;;  %v571_v5 = vadd.s32 96, %v540_v60  ;;  %vm454_vm3 = vcmp.eq.s32.totalorder %v2459_v6, %v427_v4 }
 0x169   :  { %vm485_vm6 = vmor %vm341_vm0, %vm453_vm2 }
 0x16a   :  { %vm1172_vm5 = vcmp.eq.s32.totalorder %v2459_v6, %v1146_v59  ;;  %vm1171_vm8 = vcmp.eq.s32.totalorder %v2455_v63, %v1146_v59  ;;  %vm597_vm4 = vcmp.eq.s32.totalorder %v2455_v63, %v571_v5 }
 0x16b   :  { %v256_v61 = vpop.permute.xlu1 %255  ;;  %v684_v2 = vpop.permute.xlu0 %683  ;;  %vm1204_vm11 = vmor %vm1060_vm9, %vm1172_vm5  ;;  %vm598_vm5 = vcmp.eq.s32.totalorder %v2459_v6, %v571_v5 }
 0x16c   :  { %v1904_v7 = vsel %vm1204_vm11, 1.0, %v2318_v25  ;;  %vm1203_vm13 = vmor %vm1059_vm7, %vm1171_vm8  ;;  %v715_v10 = vadd.s32 128, %v684_v2  ;;  %v284_v18 = vadd.s32 32, %v256_v61 }
 0x16d   :  { %1429 = vmatprep.mubr.f32.mxu0 %v1904_v7  ;;  %v1903_v9 = vsel %vm1203_vm13, 1.0, %v2318_v25  ;;  %vm486_vm7 = vmor %vm342_vm1, %vm454_vm3 }
 0x16e   :  { %1430 = vmatmul.mubr.f32.gmra.mrb[18].mxu0 %v1903_v9  ;;  %vm741_vm8 = vcmp.eq.s32.totalorder %v2455_v63, %v715_v10  ;;  %vm629_vm9 = vmor %vm485_vm6, %vm597_vm4  ;;  %vm742_vm10 = vcmp.eq.s32.totalorder %v2459_v6, %v715_v10 }
 0x16f   :  { %v400_v8 = vpop.permute.xlu1 %399  ;;  %v828_v0 = vpop.permute.xlu0 %827  ;;  %vm630_vm11 = vmor %vm486_vm7, %vm598_vm5 }
 0x170   :  { %v859_v11 = vadd.s32 160, %v828_v0  ;;  %vm773_vm13 = vmor %vm629_vm9, %vm741_vm8  ;;  %v428_v21 = vadd.s32 64, %v400_v8 }
 0x171   :  { %vm774_vm15 = vmor %vm630_vm11, %vm742_vm10  ;;  %vm311_vm11 = vcmp.eq.s32.totalorder %v2455_v63, %v284_v18 }
 0x172   :  { %vm885_vm12 = vcmp.eq.s32.totalorder %v2455_v63, %v859_v11  ;;  %vm886_vm14 = vcmp.eq.s32.totalorder %v2459_v6, %v859_v11 }
 0x173   :  { %v154_v12 = vpop.permute.xlu1 %153  ;;  %v972_v13 = vpop.permute.xlu0 %971  ;;  %vm917_vm2 = vmor %vm773_vm13, %vm885_vm12  ;;  %vm312_vm13 = vcmp.eq.s32.totalorder %v2459_v6, %v284_v18 }
 0x174   :  { %v1003_v14 = vadd.s32 192, %v972_v13  ;;  %vm918_vm3 = vmor %vm774_vm15, %vm886_vm14  ;;  %vm199_vm7 = vcmp.eq.s32.totalorder %v2455_v63, %v154_v12  ;;  %vm200_vm9 = vcmp.eq.s32.totalorder %v2459_v6, %v154_v12 }
 0x175   :  { %vm343_vm14 = vmor %vm199_vm7, %vm311_vm11 }
 0x176   :  { %vm1029_vm0 = vcmp.eq.s32.totalorder %v2455_v63, %v1003_v14  ;;  %vm1030_vm1 = vcmp.eq.s32.totalorder %v2459_v6, %v1003_v14  ;;  %vm344_vm15 = vmor %vm200_vm9, %vm312_vm13 }
 0x177   :  { %v1116_v15 = vpop.permute.xlu1 %1115  ;;  %v544_v17 = vpop.permute.xlu0 %543  ;;  %vm1061_vm6 = vmor %vm917_vm2, %vm1029_vm0  ;;  %vm455_vm0 = vcmp.eq.s32.totalorder %v2455_v63, %v428_v21 }
 0x178   :  { %v1147_v16 = vadd.s32 224, %v1116_v15  ;;  %vm1062_vm8 = vmor %vm918_vm3, %vm1030_vm1  ;;  %v572_v22 = vadd.s32 96, %v544_v17  ;;  %vm456_vm1 = vcmp.eq.s32.totalorder %v2459_v6, %v428_v21 }
 0x179   :  { %vm487_vm3 = vmor %vm343_vm14, %vm455_vm0 }
 0x17a   :  { %vm1174_vm4 = vcmp.eq.s32.totalorder %v2459_v6, %v1147_v16  ;;  %vm1173_vm5 = vcmp.eq.s32.totalorder %v2455_v63, %v1147_v16  ;;  %vm599_vm2 = vcmp.eq.s32.totalorder %v2455_v63, %v572_v22 }
 0x17b   :  { %v260_v19 = vpop.permute.xlu1 %259  ;;  %v688_v20 = vpop.permute.xlu0 %687  ;;  %vm1206_vm10 = vmor %vm1062_vm8, %vm1174_vm4  ;;  %vm600_vm4 = vcmp.eq.s32.totalorder %v2459_v6, %v572_v22 }
 0x17c   :  { %v1906_v23 = vsel %vm1206_vm10, 1.0, %v2318_v25  ;;  %vm1205_vm12 = vmor %vm1061_vm6, %vm1173_vm5  ;;  %v716_v26 = vadd.s32 128, %v688_v20  ;;  %v285_v33 = vadd.s32 32, %v260_v19 }
 0x17d   :  { %1434 = vmatprep.mubr.f32.mxu0 %v1906_v23  ;;  %v1905_v27 = vsel %vm1205_vm12, 1.0, %v2318_v25  ;;  %vm488_vm6 = vmor %vm344_vm15, %vm456_vm1 }
 0x17e   :  { %1435 = vmatmul.mubr.f32.gmra.mrb[20].mxu0 %v1905_v27  ;;  %vm743_vm5 = vcmp.eq.s32.totalorder %v2455_v63, %v716_v26  ;;  %vm631_vm7 = vmor %vm487_vm3, %vm599_vm2  ;;  %vm744_vm8 = vcmp.eq.s32.totalorder %v2459_v6, %v716_v26  ;;  %vm313_vm2 = vcmp.eq.s32.totalorder %v2455_v63, %v285_v33 }
 0x17f   :  { %v404_v24 = vpop.permute.xlu1 %403  ;;  %v832_v28 = vpop.permute.xlu0 %831  ;;  %vm632_vm9 = vmor %vm488_vm6, %vm600_vm4 }
 0x180   :  { %v860_v29 = vadd.s32 160, %v832_v28  ;;  %vm775_vm11 = vmor %vm631_vm7, %vm743_vm5  ;;  %v429_v40 = vadd.s32 64, %v404_v24 }
 0x181   :  { %vm776_vm13 = vmor %vm632_vm9, %vm744_vm8 }
 0x182   :  { %vm887_vm10 = vcmp.eq.s32.totalorder %v2455_v63, %v860_v29  ;;  %vm888_vm12 = vcmp.eq.s32.totalorder %v2459_v6, %v860_v29 }
 0x183   :  { %v161_v30 = vpop.permute.xlu1 %160  ;;  %v976_v31 = vpop.permute.xlu0 %975  ;;  %vm919_vm15 = vmor %vm775_vm11, %vm887_vm10  ;;  %vm314_vm11 = vcmp.eq.s32.totalorder %v2459_v6, %v285_v33 }
 0x184   :  { %v1004_v32 = vadd.s32 192, %v976_v31  ;;  %vm201_vm14 = vcmp.eq.s32.totalorder %v2455_v63, %v161_v30  ;;  %vm920_vm1 = vmor %vm776_vm13, %vm888_vm12  ;;  %vm202_vm8 = vcmp.eq.s32.totalorder %v2459_v6, %v161_v30 }
 0x185   :  { %vm2760_vm4 = vmor %vm201_vm14, %vm313_vm2  ;;  %vm457_vm14 = vcmp.eq.s32.totalorder %v2455_v63, %v429_v40 }
 0x186   :  { %vm1031_vm0 = vcmp.eq.s32.totalorder %v2455_v63, %v1004_v32  ;;  %vm1032_vm3 = vcmp.eq.s32.totalorder %v2459_v6, %v1004_v32  ;;  %vm346_vm13 = vmor %vm202_vm8, %vm314_vm11 }
 0x187   :  { %v1120_v34 = vpop.permute.xlu1 %1119  ;;  %v548_v36 = vpop.permute.xlu0 %547  ;;  %vm1063_vm5 = vmor %vm919_vm15, %vm1031_vm0  ;;  %vm458_vm0 = vcmp.eq.s32.totalorder %v2459_v6, %v429_v40 }
 0x188   :  { %v1148_v35 = vadd.s32 224, %v1120_v34  ;;  %vm1064_vm9 = vmor %vm920_vm1, %vm1032_vm3  ;;  %v573_v41 = vadd.s32 96, %v548_v36 }
 0x189   :  { %vm489_vm2 = vmor %vm2760_vm4, %vm457_vm14 }
 0x18a   :  { %vm1176_vm6 = vcmp.eq.s32.totalorder %v2459_v6, %v1148_v35  ;;  %vm1175_vm7 = vcmp.eq.s32.totalorder %v2455_v63, %v1148_v35  ;;  %vm601_vm15 = vcmp.eq.s32.totalorder %v2455_v63, %v573_v41  ;;  %vm602_vm1 = vcmp.eq.s32.totalorder %v2459_v6, %v573_v41  ;;  %vm490_vm3 = vmor %vm346_vm13, %vm458_vm0 }
 0x18b   :  { %v264_v38 = vpop.permute.xlu1 %263  ;;  %v692_v39 = vpop.permute.xlu0 %691  ;;  %vm1208_vm10 = vmor %vm1064_vm9, %vm1176_vm6 }
 0x18c   :  { %v717_v42 = vadd.s32 128, %v692_v39  ;;  %v1908_v43 = vsel %vm1208_vm10, 1.0, %v2318_v25  ;;  %vm1207_vm12 = vmor %vm1063_vm5, %vm1175_vm7  ;;  %v286_v50 = vadd.s32 32, %v264_v38 }
 0x18d   :  { %1439 = vmatprep.mubr.f32.mxu0 %v1908_v43  ;;  %v1907_v45 = vsel %vm1207_vm12, 1.0, %v2318_v25  ;;  %vm633_vm5 = vmor %vm489_vm2, %vm601_vm15 }
 0x18e   :  { %1440 = vmatmul.mubr.f32.gmra.mrb[22].mxu0 %v1907_v45  ;;  %vm745_vm6 = vcmp.eq.s32.totalorder %v2455_v63, %v717_v42  ;;  %vm746_vm7 = vcmp.eq.s32.totalorder %v2459_v6, %v717_v42  ;;  %vm634_vm8 = vmor %vm490_vm3, %vm602_vm1  ;;  %vm315_vm15 = vcmp.eq.s32.totalorder %v2455_v63, %v286_v50  ;;  %vm316_vm1 = vcmp.eq.s32.totalorder %v2459_v6, %v286_v50 }
 0x18f   :  { %v408_v44 = vpop.permute.xlu1 %407  ;;  %v836_v46 = vpop.permute.xlu0 %835  ;;  %vm777_vm10 = vmor %vm633_vm5, %vm745_vm6 }
 0x190   :  { %v861_v47 = vadd.s32 160, %v836_v46  ;;  %vm778_vm12 = vmor %vm634_vm8, %vm746_vm7  ;;  %v430_v56 = vadd.s32 64, %v408_v44 }
 0x192   :  { %vm889_vm9 = vcmp.eq.s32.totalorder %v2455_v63, %v861_v47  ;;  %vm890_vm11 = vcmp.eq.s32.totalorder %v2459_v6, %v861_v47 }
 0x193   :  { %v165_v48 = vpop.permute.xlu1 %164  ;;  %v980_v49 = vpop.permute.xlu0 %979  ;;  %vm2781_vm13 = vmor %vm777_vm10, %vm889_vm9 }
 0x194   :  { %v1005_v51 = vadd.s32 192, %v980_v49  ;;  %vm203_vm4 = vcmp.eq.s32.totalorder %v2455_v63, %v165_v48  ;;  %vm204_vm14 = vcmp.eq.s32.totalorder %v2459_v6, %v165_v48  ;;  %vm922_vm0 = vmor %vm778_vm12, %vm890_vm11  ;;  %vm459_vm12 = vcmp.eq.s32.totalorder %v2455_v63, %v430_v56 }
 0x195   :  { %vm2789_vm3 = vmor %vm203_vm4, %vm315_vm15  ;;  %vm460_vm15 = vcmp.eq.s32.totalorder %v2459_v6, %v430_v56  ;;  %v2904_v56 = vadd.s32 8, %v2420_v1 }
 0x196   :  { %vm1033_vm2 = vcmp.eq.s32.totalorder %v2455_v63, %v1005_v51  ;;  %vm1034_vm6 = vcmp.eq.s32.totalorder %v2459_v6, %v1005_v51  ;;  %vm2794_vm5 = vmor %vm204_vm14, %vm316_vm1 }
 0x197   :  { %v1124_v52 = vpop.permute.xlu1 %1123  ;;  %v552_v54 = vpop.permute.xlu0 %551  ;;  %vm1065_vm8 = vmor %vm2781_vm13, %vm1033_vm2 }
 0x198   :  { %v1149_v53 = vadd.s32 224, %v1124_v52  ;;  %v574_v58 = vadd.s32 96, %v552_v54  ;;  %vm1066_vm10 = vmor %vm922_vm0, %vm1034_vm6 }
 0x199   :  { %vm491_vm1 = vmor %vm2789_vm3, %vm459_vm12 }
 0x19a   :  { %vm1178_vm7 = vcmp.eq.s32.totalorder %v2459_v6, %v1149_v53  ;;  %vm1177_vm9 = vcmp.eq.s32.totalorder %v2455_v63, %v1149_v53  ;;  %vm603_vm4 = vcmp.eq.s32.totalorder %v2455_v63, %v574_v58  ;;  %vm604_vm13 = vcmp.eq.s32.totalorder %v2459_v6, %v574_v58  ;;  %vm492_vm0 = vmor %vm2794_vm5, %vm460_vm15  ;;  %v2900_v53 = vld [vmem:[%s2981_s2] ss:$0 sm:$0xff] }
 0x19b   :  { %v268_v59 = vpop.permute.xlu1 %267  ;;  %v696_v60 = vpop.permute.xlu0 %695  ;;  %vm1210_vm11 = vmor %vm1066_vm10, %vm1178_vm7 }
 0x19c   :  { %v718_v61 = vadd.s32 128, %v696_v60  ;;  %v1910_v62 = vsel %vm1210_vm11, 1.0, %v2318_v25  ;;  %vm1209_vm14 = vmor %vm1065_vm8, %vm1177_vm9  ;;  %v287_v8 = vadd.s32 32, %v268_v59 }
 0x19d   :  { %1444 = vmatprep.mubr.f32.mxu0 %v1910_v62  ;;  %v1909_v4 = vsel %vm1209_vm14, 1.0, %v2318_v25  ;;  %vm635_vm6 = vmor %vm491_vm1, %vm603_vm4 }
 0x19e   :  { %vm747_vm2 = vcmp.eq.s32.totalorder %v2455_v63, %v718_v61  ;;  %1445 = vmatmul.mubr.f32.gmra.mrb[24].mxu0 %v1909_v4  ;;  %vm748_vm7 = vcmp.eq.s32.totalorder %v2459_v6, %v718_v61  ;;  %vm636_vm8 = vmor %vm492_vm0, %vm604_vm13  ;;  %vm317_vm12 = vcmp.eq.s32.totalorder %v2455_v63, %v287_v8  ;;  %vm318_vm15 = vcmp.eq.s32.totalorder %v2459_v6, %v287_v8 }
 0x19f   :  { %v412_v2 = vpop.permute.xlu1 %411  ;;  %v840_v5 = vpop.permute.xlu0 %839  ;;  %vm779_vm9 = vmor %vm635_vm6, %vm747_vm2 }
 0x1a0   :  { %v862_v7 = vadd.s32 160, %v840_v5  ;;  %vm780_vm11 = vmor %vm636_vm8, %vm748_vm7  ;;  %v431_v10 = vadd.s32 64, %v412_v2 }
 0x1a2   :  { %vm891_vm3 = vcmp.eq.s32.totalorder %v2455_v63, %v862_v7  ;;  %vm892_vm4 = vcmp.eq.s32.totalorder %v2459_v6, %v862_v7  ;;  %vm461_vm0 = vcmp.eq.s32.totalorder %v2455_v63, %v431_v10  ;;  %vm462_vm7 = vcmp.eq.s32.totalorder %v2459_v6, %v431_v10 }
 0x1a3   :  { %v172_v9 = vpop.permute.xlu1 %171  ;;  %v984_v0 = vpop.permute.xlu0 %983  ;;  %vm2819_vm14 = vmor %vm779_vm9, %vm891_vm3 }
 0x1a4   :  { %vm205_vm10 = vcmp.eq.s32.totalorder %v2455_v63, %v172_v9  ;;  %vm206_vm5 = vcmp.eq.s32.totalorder %v2459_v6, %v172_v9  ;;  %v1006_v11 = vadd.s32 192, %v984_v0  ;;  %vm924_vm2 = vmor %vm780_vm11, %vm892_vm4 }
 0x1a5   :  { %vm349_vm1 = vmor %vm205_vm10, %vm317_vm12 }
 0x1a6   :  { %vm350_vm13 = vmor %vm206_vm5, %vm318_vm15  ;;  %vm1035_vm6 = vcmp.eq.s32.totalorder %v2455_v63, %v1006_v11  ;;  %vm1036_vm3 = vcmp.eq.s32.totalorder %v2459_v6, %v1006_v11 }
 0x1a7   :  { %v1128_v13 = vpop.permute.xlu1 %1127  ;;  %v556_v15 = vpop.permute.xlu0 %555  ;;  %vm2827_vm8 = vmor %vm349_vm1, %vm461_vm0 }
 0x1a8   :  { %v1150_v14 = vadd.s32 224, %v1128_v13  ;;  %v575_v16 = vadd.s32 96, %v556_v15  ;;  %vm2832_vm9 = vmor %vm350_vm13, %vm462_vm7 }
 0x1a9   :  { %vm1067_vm11 = vmor %vm2819_vm14, %vm1035_vm6 }
 0x1aa   :  { %vm1180_vm10 = vcmp.eq.s32.totalorder %v2459_v6, %v1150_v14  ;;  %vm1179_vm5 = vcmp.eq.s32.totalorder %v2455_v63, %v1150_v14  ;;  %vm1068_vm12 = vmor %vm924_vm2, %vm1036_vm3  ;;  %vm605_vm4 = vcmp.eq.s32.totalorder %v2455_v63, %v575_v16  ;;  %vm606_vm15 = vcmp.eq.s32.totalorder %v2459_v6, %v575_v16 }
 0x1ab   :  { %v272_v19 = vpop.permute.xlu1 %271  ;;  %v700_v20 = vpop.permute.xlu0 %699  ;;  %vm1212_vm1 = vmor %vm1068_vm12, %vm1180_vm10 }
 0x1ac   :  { %v719_v21 = vadd.s32 128, %v700_v20  ;;  %v1912_v22 = vsel %vm1212_vm1, 1.0, %v2318_v25  ;;  %vm1211_vm0 = vmor %vm1067_vm11, %vm1179_vm5  ;;  %v288_v27 = vadd.s32 32, %v272_v19 }
 0x1ad   :  { %vm637_vm7 = vmor %vm2827_vm8, %vm605_vm4  ;;  %1449 = vmatprep.mubr.f32.mxu0 %v1912_v22  ;;  %v1911_v24 = vsel %vm1211_vm0, 1.0, %v2318_v25 }
 0x1ae   :  { %vm749_vm13 = vcmp.eq.s32.totalorder %v2455_v63, %v719_v21  ;;  %vm750_vm14 = vcmp.eq.s32.totalorder %v2459_v6, %v719_v21  ;;  %vm638_vm2 = vmor %vm2832_vm9, %vm606_vm15  ;;  %1450 = vmatmul.mubr.f32.gmra.mrb[26].mxu0 %v1911_v24  ;;  %vm319_vm12 = vcmp.eq.s32.totalorder %v2455_v63, %v288_v27  ;;  %vm320_vm15 = vcmp.eq.s32.totalorder %v2459_v6, %v288_v27 }
 0x1af   :  { %v416_v23 = vpop.permute.xlu1 %415  ;;  %v844_v26 = vpop.permute.xlu0 %843  ;;  %vm781_vm6 = vmor %vm637_vm7, %vm749_vm13 }
 0x1b0   :  { %v863_v28 = vadd.s32 160, %v844_v26  ;;  %vm782_vm3 = vmor %vm638_vm2, %vm750_vm14  ;;  %v432_v29 = vadd.s32 64, %v416_v23 }
 0x1b2   :  { %vm893_vm10 = vcmp.eq.s32.totalorder %v2455_v63, %v863_v28  ;;  %vm894_vm11 = vcmp.eq.s32.totalorder %v2459_v6, %v863_v28  ;;  %v1952_v32 = vpop.f32.mrb[0].mxu0  ;;  %vm463_vm13 = vcmp.eq.s32.totalorder %v2455_v63, %v432_v29  ;;  %vm464_vm14 = vcmp.eq.s32.totalorder %v2459_v6, %v432_v29 }
 0x1b3   :  { %v176_v30 = vpop.permute.xlu1 %175  ;;  %vm2852_vm8 = vmor %vm781_vm6, %vm893_vm10  ;;  %v988_v33 = vpop.permute.xlu0 %987 }
 0x1b4   :  { %vm207_vm5 = vcmp.eq.s32.totalorder %v2455_v63, %v176_v30  ;;  %vm208_vm9 = vcmp.eq.s32.totalorder %v2459_v6, %v176_v30  ;;  %vm2859_vm4 = vmor %vm782_vm3, %vm894_vm11  ;;  %v1953_v35 = vpop.f32.mrb[1].mxu0  ;;  %v1007_v36 = vadd.s32 192, %v988_v33 }
 0x1b5   :  { %v1954_v37 = vadd.f32 %v1953_v35, %v1952_v32  ;;  %vm351_vm1 = vmor %vm207_vm5, %vm319_vm12 }
 0x1b6   :  { %vm352_vm0 = vmor %vm208_vm9, %vm320_vm15  ;;  %vm1037_vm7 = vcmp.eq.s32.totalorder %v2455_v63, %v1007_v36  ;;  %vm1038_vm6 = vcmp.eq.s32.totalorder %v2459_v6, %v1007_v36 }
 0x1b7   :  { %v1132_v38 = vpop.permute.xlu1 %1131  ;;  %vm495_vm2 = vmor %vm351_vm1, %vm463_vm13  ;;  %v560_v40 = vpop.permute.xlu0 %559  ;;  %v1387_v58 = vadd.f32 %v1954_v37, %v2900_v53 }
 0x1b8   :  { %v1151_v39 = vadd.s32 224, %v1132_v38  ;;  %vm496_vm3 = vmor %vm352_vm0, %vm464_vm14  ;;  %v576_v41 = vadd.s32 96, %v560_v40 }
 0x1b9   :  { %vm2870_vm10 = vmor %vm2852_vm8, %vm1037_vm7  ;;  %v1465_v61 = vmax.f32 %v1387_v58, 0.0 }
 0x1ba   :  { %vm1070_vm11 = vmor %vm2859_vm4, %vm1038_vm6  ;;  %vm1182_vm5 = vcmp.eq.s32.totalorder %v2459_v6, %v1151_v39  ;;  %vm607_vm9 = vcmp.eq.s32.totalorder %v2455_v63, %v576_v41  ;;  %vm608_vm12 = vcmp.eq.s32.totalorder %v2459_v6, %v576_v41  ;;  %vm1181_vm15 = vcmp.eq.s32.totalorder %v2455_v63, %v1151_v39 }
 0x1bb   :  { %v848_v43 = vpop.permute.xlu1 %847  ;;  %vm639_vm1 = vmor %vm495_vm2, %vm607_vm9  ;;  %v704_v44 = vpop.permute.xlu0 %703 }
 0x1bc   :  { %v864_v45 = vadd.s32 160, %v848_v43  ;;  %vm2880_vm13 = vmor %vm496_vm3, %vm608_vm12  ;;  %v720_v47 = vadd.s32 128, %v704_v44 }
 0x1bd   :  { %vm1214_vm8 = vmor %vm1070_vm11, %vm1182_vm5 }
 0x1be   :  { %vm751_vm4 = vcmp.eq.s32.totalorder %v2455_v63, %v720_v47  ;;  %vm752_vm0 = vcmp.eq.s32.totalorder %v2459_v6, %v720_v47  ;;  %vm895_vm7 = vcmp.eq.s32.totalorder %v2455_v63, %v864_v45  ;;  %v1914_v48 = vsel %vm1214_vm8, 1.0, %v2318_v25  ;;  %vm1213_vm14 = vmor %vm2870_vm10, %vm1181_vm15 }
 0x1bf   :  { %v1136_v49 = vpop.permute.xlu1 %1135  ;;  %vm783_vm2 = vmor %vm639_vm1, %vm751_vm4  ;;  %vm896_vm6 = vcmp.eq.s32.totalorder %v2459_v6, %v864_v45  ;;  %1454 = vmatprep.mubr.f32.mxu0 %v1914_v48  ;;  %v1913_v50 = vsel %vm1213_vm14, 1.0, %v2318_v25  ;;  %v992_v51 = vpop.permute.xlu0 %991  ;;  %v1680_v48 = vld [vmem:[#allocation8] sm:$0xff]  ;;  %vm1666_vm14 = vcmask 1042434  }
 0x1c0   :  { %v1152_v52 = vadd.s32 224, %v1136_v49  ;;  %vm784_vm3 = vmor %vm2880_vm13, %vm752_vm0  ;;  %1455 = vmatmul.mubr.f32.gmra.mrb[28].mxu0 %v1913_v50  ;;  %v1008_v3 = vadd.s32 192, %v992_v51  ;;  %vm1578_vm0 = vcmp.lt.s32.totalorder %v2904_v56, 9  ;;  %v1681_v49 = vld [vmem:[#allocation8 + $0x8] sm:$0xff]  ;;  %v1778_v56 = vld [vmem:[#allocation9 + $0x20] sm:$0xff] }
 0x1c1   :  { %vm927_vm11 = vmor %vm783_vm2, %vm895_vm7  ;;  %vm1664_vm7 = vcmask 1041409   ;;  %v2137_v51 = vpack.c.bf16 %v1681_v49, %v1680_v48  ;;  %vm2320_vm2 = vmmov 0  }
 0x1c2   :  { %vm928_vm5 = vmor %vm784_vm3, %vm896_vm6  ;;  %vm1039_vm9 = vcmp.eq.s32.totalorder %v2455_v63, %v1008_v3  ;;  %vm1040_vm10 = vcmp.eq.s32.totalorder %v2459_v6, %v1008_v3  ;;  %vm1184_vm12 = vcmp.eq.s32.totalorder %v2459_v6, %v1152_v52  ;;  %vm1183_vm1 = vcmp.eq.s32.totalorder %v2455_v63, %v1152_v52  ;;  %v1955_v54 = vpop.f32.mrb[2].mxu0  ;;  %2066 = vmatprep.mubr.msk.f32.mxu1 %vm2320_vm2, %v2318_v25 }
 0x1c3   :  { %vm1071_vm15 = vmor %vm927_vm11, %vm1039_vm9  ;;  %v1956_v55 = vpop.f32.mrb[3].mxu0  ;;  %v2319_v52 = vmov 0.0|0.0   ;;  %vm1668_vm6 = vcmask 1043459   ;;  %vm1670_vm3 = vcmask 1044484   ;;  %vm1672_vm11 = vcmask 1045509  }
 0x1c4   :  { %vm1072_vm13 = vmor %vm928_vm5, %vm1040_vm10  ;;  %v1957_v57 = vadd.f32 %v1956_v55, %v1955_v54  ;;  %2136 = vmatprep.subr.bf16.mxu1 %v2319_v52  ;;  %v1682_v54 = vld [vmem:[#allocation8 + $0x10] sm:$0xff]  ;;  %v1683_v55 = vld [vmem:[#allocation8 + $0x18] sm:$0xff]  ;;  %vm1674_vm5 = vcmask 1046534   ;;  %vm1676_vm9 = vcmask 1047559  }
 0x1c5   :  { %vm1216_vm8 = vmor %vm1072_vm13, %vm1184_vm12  ;;  %2138 = vmatpush3.bf16.msra.mxu1 %v2137_v51 }
 0x1c6   :  { %v1916_v6 = vsel %vm1216_vm8, 1.0, %v2318_v25  ;;  %vm1215_vm4 = vmor %vm1071_vm15, %vm1183_vm1  ;;  %v1392_v59 = vadd.f32 %v1957_v57, %v2900_v53  ;;  %2139 = vmatprep.subr.bf16.mxu1 %v2319_v52  ;;  %v2140_v57 = vpack.c.bf16 %v1683_v55, %v1682_v54 }
 0x1c7   :  { %1459 = vmatprep.mubr.f32.mxu0 %v1916_v6  ;;  %v1915_v60 = vsel %vm1215_vm4, 1.0, %v2318_v25  ;;  %v1684_v6 = vld [vmem:[#allocation8 + $0x20] sm:$0xff] }
 0x1c8   :  { %1460 = vmatmul.mubr.f32.gmra.mrb[30].mxu0 %v1915_v60  ;;  %v1466_v63 = vmax.f32 %v1392_v59, 0.0  ;;  %v1685_v59 = vld [vmem:[#allocation8 + $0x28] sm:$0xff] }
 0x1c9   :  { %2141 = vmatpush3.bf16.msra.mxu1 %v2140_v57  ;;  %v2143_v60 = vpack.c.bf16 %v1685_v59, %v1684_v6 }
 0x1ca   :  { %v1584_v1 = vsel %vm1578_vm0, %v1466_v63, 0.0  ;;  %2142 = vmatprep.subr.bf16.mxu1 %v2319_v52  ;;  %v1686_v63 = vld [vmem:[#allocation8 + $0x30] sm:$0xff] }
 0x1cb   :  { %v1600_v62 = vmax.f32 %v1465_v61, %v1584_v1  ;;  %v1687_v61 = vld [vmem:[#allocation8 + $0x38] sm:$0xff] }
 0x1cc   :  { %v2146_v1 = vpack.c.bf16 %v1687_v61, %v1686_v63 }
 0x1cd   :  { %v1601_v8 = vrot.slane %v1600_v62, 4  ;;  %2144 = vmatpush3.bf16.msra.mxu1 %v2143_v60 }
 0x1ce   :  { %2145 = vmatprep.subr.bf16.mxu1 %v2319_v52 }
 0x1cf   :  { %v1602_v12 = vmax.f32 %v1600_v62, %v1601_v8 }
 0x1d1   :  { %v1603_v16 = vrot.slane %v1602_v12, 2  ;;  %2147 = vmatpush3.bf16.msra.mxu1 %v2146_v1 }
 0x1d2   :  { %v1958_v2 = vpop.f32.mrb[4].mxu0  ;;  %2148 = vmatprep.subr.bf16.mxu1 %v2319_v52 }
 0x1d3   :  { %v1959_v4 = vpop.f32.mrb[5].mxu0  ;;  %v1604_v19 = vmax.f32 %v1602_v12, %v1603_v16  ;;  %v1691_v12 = vld [vmem:[#allocation8 + $0x58] sm:$0xff] }
 0x1d4   :  { %v1960_v5 = vadd.f32 %v1959_v4, %v1958_v2 }
 0x1d5   :  { %v1605_v23 = vrot.slane %v1604_v19, 1 }
 0x1d6   :  { %v1397_v10 = vadd.f32 %v1960_v5, %v2900_v53  ;;  %v1688_v5 = vld [vmem:[#allocation8 + $0x40] sm:$0xff] }
 0x1d7   :  { %v1606_v29 = vmax.f32 %v1604_v19, %v1605_v23 }
 0x1d8   :  { %v1467_v14 = vmax.f32 %v1397_v10, 0.0 }
 0x1e2   :  { %v1961_v7 = vpop.f32.mrb[6].mxu0 }
 0x1e3   :  { %v1962_v9 = vpop.f32.mrb[7].mxu0 }
 0x1e4   :  { %v1963_v0 = vadd.f32 %v1962_v9, %v1961_v7  ;;  %v1689_v7 = vld [vmem:[#allocation8 + $0x48] sm:$0xff] }
 0x1e5   :  { %v2149_v9 = vpack.c.bf16 %v1689_v7, %v1688_v5 }
 0x1e6   :  { %v1402_v11 = vadd.f32 %v1963_v0, %v2900_v53 }
 0x1e7   :  { %2150 = vmatpush3.bf16.msra.mxu1 %v2149_v9 }
 0x1e8   :  { %v1468_v13 = vmax.f32 %v1402_v11, 0.0  ;;  %2151 = vmatprep.subr.bf16.mxu1 %v2319_v52  ;;  %v1690_v11 = vld [vmem:[#allocation8 + $0x50] sm:$0xff] }
 0x1ea   :  { %v1586_v15 = vsel %vm1578_vm0, %v1468_v13, 0.0 }
 0x1eb   :  { %v1607_v17 = vmax.f32 %v1467_v14, %v1586_v15  ;;  %v2152_v14 = vpack.c.bf16 %v1691_v12, %v1690_v11 }
 0x1ed   :  { %v1608_v18 = vrot.slane %v1607_v17, 4  ;;  %2153 = vmatpush3.bf16.msra.mxu1 %v2152_v14 }
 0x1ee   :  { %2154 = vmatprep.subr.bf16.mxu1 %v2319_v52 }
 0x1ef   :  { %v1609_v20 = vmax.f32 %v1607_v17, %v1608_v18  ;;  %v1692_v17 = vld [vmem:[#allocation8 + $0x60] sm:$0xff]  ;;  %v1693_v18 = vld [vmem:[#allocation8 + $0x68] sm:$0xff] }
 0x1f0   :  { %v2155_v19 = vpack.c.bf16 %v1693_v18, %v1692_v17 }
 0x1f1   :  { %v1610_v21 = vrot.slane %v1609_v20, 2 }
 0x1f2   :  { %v1964_v22 = vpop.f32.mrb[8].mxu0  ;;  %2156 = vmatpush3.bf16.msra.mxu1 %v2155_v19 }
 0x1f3   :  { %v1611_v24 = vmax.f32 %v1609_v20, %v1610_v21  ;;  %v1965_v26 = vpop.f32.mrb[9].mxu0  ;;  %v1694_v20 = vld [vmem:[#allocation8 + $0x70] sm:$0xff]  ;;  %v1695_v21 = vld [vmem:[#allocation8 + $0x78] sm:$0xff]  ;;  %2157 = vmatprep.subr.bf16.mxu1 %v2319_v52 }
 0x1f4   :  { %v1966_v27 = vadd.f32 %v1965_v26, %v1964_v22 }
 0x1f5   :  { %v1612_v28 = vrot.slane %v1611_v24, 1 }
 0x1f6   :  { %v1407_v35 = vadd.f32 %v1966_v27, %v2900_v53 }
 0x1f7   :  { %v1613_v30 = vmax.f32 %v1611_v24, %v1612_v28  ;;  %v2158_v24 = vpack.c.bf16 %v1695_v21, %v1694_v20 }
 0x1f8   :  { %v1469_v38 = vmax.f32 %v1407_v35, 0.0 }
 0x1f9   :  { %v1665_v31 = vsel %vm1664_vm7, %v1613_v30, %v1606_v29  ;;  %2159 = vmatpush3.bf16.msra.mxu1 %v2158_v24 }
 0x1fa   :  { %2160 = vmatprep.subr.bf16.mxu1 %v2319_v52 }
 0x202   :  { %v1967_v32 = vpop.f32.mrb[10].mxu0 }
 0x203   :  { %v1968_v33 = vpop.f32.mrb[11].mxu0 }
 0x204   :  { %v1969_v34 = vadd.f32 %v1968_v33, %v1967_v32 }
 0x206   :  { %v1412_v36 = vadd.f32 %v1969_v34, %v2900_v53 }
 0x208   :  { %v1470_v37 = vmax.f32 %v1412_v36, 0.0 }
 0x20a   :  { %v1588_v39 = vsel %vm1578_vm0, %v1470_v37, 0.0 }
 0x20b   :  { %v1614_v40 = vmax.f32 %v1469_v38, %v1588_v39 }
 0x20d   :  { %v1615_v41 = vrot.slane %v1614_v40, 4 }
 0x20f   :  { %v1616_v42 = vmax.f32 %v1614_v40, %v1615_v41 }
 0x211   :  { %v1617_v43 = vrot.slane %v1616_v42, 2 }
 0x212   :  { %v1970_v44 = vpop.f32.mrb[12].mxu0 }
 0x213   :  { %v1618_v45 = vmax.f32 %v1616_v42, %v1617_v43  ;;  %v1971_v46 = vpop.f32.mrb[13].mxu0 }
 0x214   :  { %v1972_v47 = vadd.f32 %v1971_v46, %v1970_v44 }
 0x215   :  { %v1619_v50 = vrot.slane %v1618_v45, 1 }
 0x216   :  { %v1417_v8 = vadd.f32 %v1972_v47, %v2900_v53 }
 0x217   :  { %v1620_v3 = vmax.f32 %v1618_v45, %v1619_v50 }
 0x218   :  { %v1471_v13 = vmax.f32 %v1417_v8, 0.0 }
 0x219   :  { %v1667_v58 = vsel %vm1666_vm14, %v1620_v3, %v1665_v31 }
 0x222   :  { %v1973_v62 = vpop.f32.mrb[14].mxu0 }
 0x223   :  { %v1974_v2 = vpop.f32.mrb[15].mxu0 }
 0x224   :  { %v1975_v4 = vadd.f32 %v1974_v2, %v1973_v62 }
 0x226   :  { %v1422_v0 = vadd.f32 %v1975_v4, %v2900_v53 }
 0x228   :  { %v1472_v10 = vmax.f32 %v1422_v0, 0.0 }
 0x22a   :  { %v1590_v15 = vsel %vm1578_vm0, %v1472_v10, 0.0 }
 0x22b   :  { %v1621_v16 = vmax.f32 %v1471_v13, %v1590_v15 }
 0x22d   :  { %v1622_v22 = vrot.slane %v1621_v16, 4 }
 0x22f   :  { %v1623_v23 = vmax.f32 %v1621_v16, %v1622_v22 }
 0x231   :  { %v1624_v26 = vrot.slane %v1623_v23, 2  ;;  %v1976_v27 = vpop.f32.mrb[16].mxu0 }
 0x232   :  { %v1977_v28 = vpop.f32.mrb[17].mxu0 }
 0x233   :  { %v1625_v29 = vmax.f32 %v1623_v23, %v1624_v26  ;;  %v1978_v30 = vadd.f32 %v1977_v28, %v1976_v27 }
 0x235   :  { %v1626_v31 = vrot.slane %v1625_v29, 1  ;;  %v1427_v37 = vadd.f32 %v1978_v30, %v2900_v53 }
 0x237   :  { %v1627_v32 = vmax.f32 %v1625_v29, %v1626_v31  ;;  %v1473_v40 = vmax.f32 %v1427_v37, 0.0 }
 0x239   :  { %v1669_v33 = vsel %vm1668_vm6, %v1627_v32, %v1667_v58 }
 0x241   :  { %v1979_v34 = vpop.f32.mrb[18].mxu0 }
 0x242   :  { %v1980_v35 = vpop.f32.mrb[19].mxu0 }
 0x243   :  { %v1981_v36 = vadd.f32 %v1980_v35, %v1979_v34 }
 0x245   :  { %v1432_v38 = vadd.f32 %v1981_v36, %v2900_v53 }
 0x247   :  { %v1474_v39 = vmax.f32 %v1432_v38, 0.0 }
 0x249   :  { %v1592_v41 = vsel %vm1578_vm0, %v1474_v39, 0.0 }
 0x24a   :  { %v1628_v42 = vmax.f32 %v1473_v40, %v1592_v41 }
 0x24c   :  { %v1629_v43 = vrot.slane %v1628_v42, 4 }
 0x24e   :  { %v1630_v44 = vmax.f32 %v1628_v42, %v1629_v43 }
 0x250   :  { %v1631_v45 = vrot.slane %v1630_v44, 2 }
 0x251   :  { %v1982_v46 = vpop.f32.mrb[20].mxu0 }
 0x252   :  { %v1632_v47 = vmax.f32 %v1630_v44, %v1631_v45  ;;  %v1983_v48 = vpop.f32.mrb[21].mxu0  ;;  %v1774_v45 = vld [vmem:[#allocation9] sm:$0xff] }
 0x253   :  { %v1984_v49 = vadd.f32 %v1983_v48, %v1982_v46  ;;  %v1775_v46 = vld [vmem:[#allocation9 + $0x8] sm:$0xff] }
 0x254   :  { %v1633_v50 = vrot.slane %v1632_v47, 1 }
 0x255   :  { %v1437_v58 = vadd.f32 %v1984_v49, %v2900_v53  ;;  %v2161_v49 = vpack.c.bf16 %v1775_v46, %v1774_v45 }
 0x256   :  { %v1634_v51 = vmax.f32 %v1632_v47, %v1633_v50 }
 0x257   :  { %v1475_v60 = vmax.f32 %v1437_v58, 0.0  ;;  %v1781_v58 = vld [vmem:[#allocation9 + $0x38] sm:$0xff] }
 0x258   :  { %v1671_v3 = vsel %vm1670_vm3, %v1634_v51, %v1669_v33  ;;  %v1776_v51 = vld [vmem:[#allocation9 + $0x10] sm:$0xff] }
 0x261   :  { %v1985_v54 = vpop.f32.mrb[22].mxu0 }
 0x262   :  { %v1986_v55 = vpop.f32.mrb[23].mxu0 }
 0x263   :  { %v1987_v57 = vadd.f32 %v1986_v55, %v1985_v54  ;;  %v1779_v54 = vld [vmem:[#allocation9 + $0x28] sm:$0xff] }
 0x264   :  { %v2167_v55 = vpack.c.bf16 %v1779_v54, %v1778_v56 }
 0x265   :  { %v1442_v6 = vadd.f32 %v1987_v57, %v2900_v53  ;;  %v1780_v57 = vld [vmem:[#allocation9 + $0x30] sm:$0xff] }
 0x267   :  { %v1476_v59 = vmax.f32 %v1442_v6, 0.0  ;;  %v2170_v6 = vpack.c.bf16 %v1781_v58, %v1780_v57 }
 0x269   :  { %v1594_v63 = vsel %vm1578_vm0, %v1476_v59, 0.0  ;;  %v1782_v59 = vld [vmem:[#allocation9 + $0x40] sm:$0xff] }
 0x26a   :  { %v1635_v61 = vmax.f32 %v1475_v60, %v1594_v63  ;;  %v1783_v60 = vld [vmem:[#allocation9 + $0x48] sm:$0xff] }
 0x26b   :  { %v2173_v63 = vpack.c.bf16 %v1783_v60, %v1782_v59 }
 0x26c   :  { %v1636_v1 = vrot.slane %v1635_v61, 4 }
 0x26e   :  { %v1637_v62 = vmax.f32 %v1635_v61, %v1636_v1  ;;  %v1785_v61 = vld [vmem:[#allocation9 + $0x58] sm:$0xff] }
 0x270   :  { %v1638_v2 = vrot.slane %v1637_v62, 2 }
 0x271   :  { %v1988_v4 = vpop.f32.mrb[24].mxu0 }
 0x272   :  { %v1639_v5 = vmax.f32 %v1637_v62, %v1638_v2  ;;  %v1989_v7 = vpop.f32.mrb[25].mxu0  ;;  %v1786_v62 = vld [vmem:[#allocation9 + $0x60] sm:$0xff]  ;;  %v1787_v2 = vld [vmem:[#allocation9 + $0x68] sm:$0xff] }
 0x273   :  { %v1990_v8 = vadd.f32 %v1989_v7, %v1988_v4  ;;  %v2179_v4 = vpack.c.bf16 %v1787_v2, %v1786_v62  ;;  %v1789_v7 = vld [vmem:[#allocation9 + $0x78] sm:$0xff] }
 0x274   :  { %v1640_v9 = vrot.slane %v1639_v5, 1 }
 0x275   :  { %v1447_v14 = vadd.f32 %v1990_v8, %v2900_v53 }
 0x276   :  { %v1641_v0 = vmax.f32 %v1639_v5, %v1640_v9  ;;  %v1788_v5 = vld [vmem:[#allocation9 + $0x70] sm:$0xff]  ;;  %v1918_v9 = vld [vmem:[%s2983_s4] ss:$0 sm:$0xff] }
 0x277   :  { %v1477_v17 = vmax.f32 %v1447_v14, 0.0  ;;  %v2182_v8 = vpack.c.bf16 %v1789_v7, %v1788_v5 }
 0x278   :  { %v1673_v10 = vsel %vm1672_vm11, %v1641_v0, %v1671_v3 }
 0x281   :  { %v1991_v11 = vpop.f32.mrb[26].mxu0 }
 0x282   :  { %v1992_v12 = vpop.f32.mrb[27].mxu0 }
 0x283   :  { %v1993_v13 = vadd.f32 %v1992_v12, %v1991_v11 }
 0x285   :  { %v1452_v15 = vadd.f32 %v1993_v13, %v2900_v53  ;;  %v1919_v13 = vld [vmem:[%s2985_s6] ss:$0 sm:$0xff] }
 0x287   :  { %v1478_v16 = vmax.f32 %v1452_v15, 0.0 }
 0x289   :  { %v1596_v18 = vsel %vm1578_vm0, %v1478_v16, 0.0 }
 0x28a   :  { %v1642_v19 = vmax.f32 %v1477_v17, %v1596_v18 }
 0x28c   :  { %v1643_v20 = vrot.slane %v1642_v19, 4 }
 0x28e   :  { %v1644_v21 = vmax.f32 %v1642_v19, %v1643_v20 }
 0x290   :  { %v1645_v22 = vrot.slane %v1644_v21, 2 }
 0x292   :  { %v1646_v24 = vmax.f32 %v1644_v21, %v1645_v22 }
 0x293   :  { %v1994_v23 = vpop.f32.mrb[28].mxu0 }
 0x294   :  { %v1995_v26 = vpop.f32.mrb[29].mxu0  ;;  %v1647_v28 = vrot.slane %v1646_v24, 1 }
 0x295   :  { %v1996_v27 = vadd.f32 %v1995_v26, %v1994_v23 }
 0x296   :  { %v1648_v29 = vmax.f32 %v1646_v24, %v1647_v28 }
 0x297   :  { %v1457_v34 = vadd.f32 %v1996_v27, %v2900_v53 }
 0x298   :  { %v1675_v30 = vsel %vm1674_vm5, %v1648_v29, %v1673_v10 }
 0x299   :  { %v1479_v37 = vmax.f32 %v1457_v34, 0.0 }
 0x29b   :  { %v1997_v31 = vpop.f32.mrb[30].mxu0 }
 0x29c   :  { %v1998_v32 = vpop.f32.mrb[31].mxu0 }
 0x29d   :  { %v1999_v33 = vadd.f32 %v1998_v32, %v1997_v31 }
 0x29f   :  { %v1462_v35 = vadd.f32 %v1999_v33, %v2900_v53  ;;  %v1777_v53 = vld [vmem:[#allocation9 + $0x18] sm:$0xff] }
 0x2a0   :  { %v2164_v3 = vpack.c.bf16 %v1777_v53, %v1776_v51 }
 0x2a1   :  { %v1480_v36 = vmax.f32 %v1462_v35, 0.0 }
 0x2a3   :  { %v1598_v38 = vsel %vm1578_vm0, %v1480_v36, 0.0 }
 0x2a4   :  { %v1649_v39 = vmax.f32 %v1479_v37, %v1598_v38 }
 0x2a6   :  { %v1650_v40 = vrot.slane %v1649_v39, 4 }
 0x2a8   :  { %v1651_v41 = vmax.f32 %v1649_v39, %v1650_v40 }
 0x2aa   :  { %v1652_v42 = vrot.slane %v1651_v41, 2 }
 0x2ac   :  { %v1653_v43 = vmax.f32 %v1651_v41, %v1652_v42 }
 0x2ae   :  { %v1654_v44 = vrot.slane %v1653_v43, 1 }
 0x2b0   :  { %v1655_v47 = vmax.f32 %v1653_v43, %v1654_v44 }
 0x2b2   :  { %v1677_v48 = vsel %vm1676_vm9, %v1655_v47, %v1675_v30 }
 0x2b3   :  { %v1679_v50 = vmax.f32 %v1677_v48, 0.0 }
 0x2b5   :  { %2067 = vmatmul.mubr.f32.vlgmr.msra.gmra.mrb[0].mxu1 %v1679_v50 }
 0x2b6   :  { %2162 = vmatpush3.bf16.msra.mxu1 %v2161_v49  ;;  %2101 = vmatprep.mubr.msk.f32.mxu1 %vm2320_vm2, %v2318_v25  ;;  %v1784_v25 = vld [vmem:[#allocation9 + $0x50] sm:$0xff] }
 0x2b7   :  { %2163 = vmatprep.subr.bf16.mxu1 %v2319_v52  ;;  %v2176_v1 = vpack.c.bf16 %v1785_v61, %v1784_v25 }
 0x2ba   :  { %2165 = vmatpush3.bf16.msra.mxu1 %v2164_v3 }
 0x2bb   :  { %2166 = vmatprep.subr.bf16.mxu1 %v2319_v52 }
 0x2be   :  { %2168 = vmatpush3.bf16.msra.mxu1 %v2167_v55 }
 0x2bf   :  { %2169 = vmatprep.subr.bf16.mxu1 %v2319_v52 }
 0x2c2   :  { %2171 = vmatpush3.bf16.msra.mxu1 %v2170_v6 }
 0x2c3   :  { %2172 = vmatprep.subr.bf16.mxu1 %v2319_v52 }
 0x2c6   :  { %2174 = vmatpush3.bf16.msra.mxu1 %v2173_v63 }
 0x2c7   :  { %2175 = vmatprep.subr.bf16.mxu1 %v2319_v52 }
 0x2ca   :  { %2177 = vmatpush3.bf16.msra.mxu1 %v2176_v1 }
 0x2cb   :  { %2178 = vmatprep.subr.bf16.mxu1 %v2319_v52 }
 0x2ce   :  { %2180 = vmatpush3.bf16.msra.mxu1 %v2179_v4 }
 0x2cf   :  { %2181 = vmatprep.subr.bf16.mxu1 %v2319_v52 }
 0x2d2   :  { %2183 = vmatpush3.bf16.msra.mxu1 %v2182_v8 }
 0x388   :  { %v1769_v0 = vpop.f32.mrb[0].mxu1 }
 0x389   :  { %v1770_v10 = vadd.f32 %v1918_v9, %v1769_v0  ;;  %v2068_v11 = vpop.f32.mrb[1].mxu1 }
 0x38b   :  { %v1773_v12 = vmax.f32 %v1770_v10, 0.0 }
 0x38d   :  { %2102 = vmatmul.mubr.f32.vlgmr.msra.gmra.mrb[2].mxu1 %v1773_v12 }
 0x460   :  { %v1863_v52 = vpop.f32.mrb[2].mxu1 }
 0x461   :  { %v1864_v14 = vadd.f32 %v1919_v13, %v1863_v52  ;;  %v2103_v15 = vpop.f32.mrb[3].mxu1 }
 0x463   :  { %1867 = vst [vmem:[#allocation11] sm:$0xff] %v1864_v14 }
 0x464   :  { %2293 = shalt.err (!%p2290_p8)
}
 0x465   :  { %s2294_s9 = scalar_lea.hbm %s2986_s7, 128 }
 0x466   :  { %p2295_p9 = scmp.ne.s32.totalorder %s2986_s7, %s2294_s9  ;;  %p2298_p10 = scmp.lt.u32.totalorder %s2294_s9, %s2986_s7 }
 0x468   :  { %p2300_p11 = pnand %p2298_p10, %p2295_p9 }
 0x46a   :  { %2303 = shalt.err (!%p2300_p11)
}
 0x46b   :  { %1877 = dma.vmem_to_hbm [thread:$0]  %s1875_s29, 128, %s2986_s7, [#allocation5]  }
 0x46c   :  { %2310 = dma.done.wait [#allocation5], 128  }
 0x46d   :  { %2311 = vsyncadd [#allocation5], 4294967168 }
 0x46e   :  { %1881 = vsyncpa [#allocation4], 1 }
 0x46f   :  { %1882 = vsyncpa [#allocation7], 1 }
 0x470   :  { %1883 = vsyncpa [#allocation10], 1 }
 0x471   :  { %1884 = vsyncpa [#allocation5], 1 }

</bundles_post_ra>
